<compile_context>
chip_gen: v5e
topology: v5e:2x2
jax: 0.10.0
libtpu: 0.0.40
codegen_flags: <defaults>
</compile_context>

<pallas_src>
import functools

import numpy as np
import jax
import jax.numpy as jnp
from jax.experimental import pallas as pl
from jax.experimental.pallas import tpu as pltpu


def _shifted_dft_matrix(n: int) -> np.ndarray:
    """Matrix D with D @ x == fftshift(fft_ortho(ifftshift(x))) along one axis."""
    eye = np.eye(n, dtype=np.complex64)
    x = np.fft.ifftshift(eye, axes=0)
    y = np.fft.fft(x, axis=0, norm="ortho")
    return np.fft.fftshift(y, axes=0).astype(np.complex64)


def _round_up(x: int, m: int) -> int:
    return ((x + m - 1) // m) * m


def _tpu_vmem_capacity() -> int:
    """Best-effort device VMEM capacity; conservative 64 MiB fallback (v7x-safe)."""
    try:
        v = int(getattr(pltpu.get_tpu_info(), "vmem_capacity_bytes"))
        if v > 0:
            return v
    except Exception:
        pass
    return 64 << 20


def _cmg_post_kernel(out2_ref, inpr_ref, inpi_ref,
                     dhr_ref, dhi_ref, dhs_ref, dwr_ref, dwi_ref, dws_ref,
                     cmgr_ref, cmgi_ref, kfr_ref, kfi_ref, img_ref,
                     *ssq_refs, cb, accumulate_ssq):
    c_step = pl.program_id(1)  # coil-block step (reduction axis for the RSS accumulator)

    if accumulate_ssq:
        (ssq_ref,) = ssq_refs

        @pl.when(c_step == 0)
        def _():
            ssq_ref[...] = jnp.zeros_like(ssq_ref)

    # Grid-invariant bf16 DFT matrices (single-buffered; fetched once).
    dhr, dhi, dhs = dhr_ref[...], dhi_ref[...], dhs_ref[...]
    dwr, dwi, dws = dwr_ref[...], dwi_ref[...], dws_ref[...]
    dot = lambda a, b: jnp.dot(a, b, preferred_element_type=jnp.float32)

    # Statically unrolled loop over the cb coils of this block.
    for j in range(cb):
        # Residual add.  Network-output channels are interleaved [r, i] per coil;
        # de-interleave here instead of an XLA split pass.
        xr = out2_ref[2 * j] + inpr_ref[j]
        xi = out2_ref[2 * j + 1] + inpi_ref[j]
        cmgr_ref[j] = xr
        cmgi_ref[j] = xi

        # img = |cmg|; accumulate the pre-sqrt sum of squares for the RSS directly.
        ssq = xr * xr + xi * xi
        img_ref[j] = jnp.sqrt(ssq)
        if accumulate_ssq:
            ssq_ref[0] += ssq

        # kspace = fftshift(fft2_ortho(ifftshift(cmg))) folded into K = Dh @ X @ DwT.
        # Karatsuba complex matmul (3 real matmuls per side), bf16 operands, f32 acc.
        xr_b = xr.astype(jnp.bfloat16)
        xi_b = xi.astype(jnp.bfloat16)
        xs_b = (xr + xi).astype(jnp.bfloat16)
        t1 = dot(dhr, xr_b)
        t2 = dot(dhi, xi_b)
        t3 = dot(dhs, xs_b)
        tr = t1 - t2
        ti = t3 - t1 - t2

        tr_b = tr.astype(jnp.bfloat16)
        ti_b = ti.astype(jnp.bfloat16)
        ts_b = (tr + ti).astype(jnp.bfloat16)
        u1 = dot(tr_b, dwr)
        u2 = dot(ti_b, dwi)
        u3 = dot(ts_b, dws)
        kfr_ref[j] = u1 - u2
        kfi_ref[j] = u3 - u1 - u2


def post_process_cmg_img(output, targets, extra_params, *,
                         challenge="multicoil", output_mode="cmg", resolution=320,
                         num_cores=1):
    """Pallas port of PostProcessCMGIMG.forward (output_mode='cmg').

    num_cores: set to 2 on multi-TensorCore parts (v7x / megacore) to shard the coil
    loop across cores via CORE_PARALLEL; defaults to 1 (correct & optimal on v5e/v6e).
    """
    if challenge not in ("singlecoil", "multicoil"):
        raise ValueError('Challenge should either be "singlecoil" or "multicoil"')
    if output.shape[0] > 1:
        raise NotImplementedError("Batch size is expected to be 1.")
    if output_mode != "cmg":
        # TODO(synk): output_mode='img' (relu(output + img_inputs)) path not ported here.
        raise NotImplementedError("Only output_mode='cmg' is implemented in Pallas.")

    B, C, H, W, two = targets["cmg_targets"].shape
    assert two == 2
    assert H % 2 == 0 and W % 2 == 0, "Not expected to have sides with odd lengths."

    # nchw_to_kspace channel semantics: channel 2c = real, 2c+1 = imag of coil c.
    # Center-crop any padded network-output width down to the target width.
    left = (output.shape[-1] - W) // 2
    out2 = jnp.asarray(output, jnp.float32)[0, :, :, left:left + W]      # (2C, H, W)
    assert out2.shape == (2 * C, H, W), "Reconstruction and target sizes are different."

    cmg_inputs = jnp.asarray(targets["cmg_inputs"], jnp.float32)[0]      # (C, H, W, 2)
    inp_r = cmg_inputs[..., 0]
    inp_i = cmg_inputs[..., 1]

    # Lane-align the width: zero-pad planes to Wp (multiple of 128).  The W-DFT matrix
    # is zero-padded accordingly, so padded k-space columns are exactly zero.
    Wp = _round_up(W, 128)
    if Wp != W:
        pad = ((0, 0), (0, 0), (0, Wp - W))
        out2 = jnp.pad(out2, pad)
        inp_r = jnp.pad(inp_r, pad)
        inp_i = jnp.pad(inp_i, pad)

    # Shift-absorbing ortho DFT matrices in bf16 (the matmuls are single-pass bf16).
    dh = _shifted_dft_matrix(H)
    dwT = np.zeros((Wp, Wp), np.complex64)
    dwT[:W, :W] = _shifted_dft_matrix(W).T
    dhr = jnp.asarray(dh.real, jnp.bfloat16)
    dhi = jnp.asarray(dh.imag, jnp.bfloat16)
    dhs = jnp.asarray(dh.real + dh.imag, jnp.bfloat16)
    dwr = jnp.asarray(dwT.real, jnp.bfloat16)
    dwi = jnp.asarray(dwT.imag, jnp.bfloat16)
    dws = jnp.asarray(dwT.real + dwT.imag, jnp.bfloat16)

    multicoil = challenge == "multicoil"
    scale = jnp.asarray(extra_params["cmg_scales"], jnp.float32) if multicoil else None
    scalar_scale = bool(multicoil and scale.size == 1)
    accumulate_ssq = multicoil and scalar_scale   # kernel-side RSS needs a scalar scale

    vmem_cap = _tpu_vmem_capacity()

    def build_and_run(nc):
        cpc = C // nc                               # coils per core
        plane = H * Wp * 4
        mats = (3 * H * H + 3 * Wp * Wp) * 2        # bf16, single-buffered

        def need(cb):
            streams = 4 * cb + 5 * cb + (1 if accumulate_ssq else 0)
            return 2 * streams * plane + mats       # default double-buffered planes

        # Coils per grid step: biggest that fits the device VMEM budget (amortizes the
        # per-step overhead on 128 MiB parts; stays at 1 on 64 MiB parts like v7x).
        budget = max(vmem_cap - (16 << 20), vmem_cap // 2)
        cb = 1
        for cand in (4, 2):
            if cpc % cand == 0 and need(cand) <= budget:
                cb = cand
                break
        vmem_limit = int(min(vmem_cap - (4 << 20),
                             max(16 << 20, need(cb) + (8 << 20))))

        blk = lambda p, c: (p * (cpc // cb) + c, 0, 0)
        coil_spec = pl.BlockSpec((cb, H, Wp), blk)
        out2_spec = pl.BlockSpec((2 * cb, H, Wp), blk)     # interleaved [r,i] channels
        mat_h = pl.BlockSpec((H, H), lambda p, c: (0, 0), pipeline_mode=pl.Buffered(1))
        mat_w = pl.BlockSpec((Wp, Wp), lambda p, c: (0, 0), pipeline_mode=pl.Buffered(1))

        chw = jax.ShapeDtypeStruct((C, H, Wp), jnp.float32)
        out_shape = [chw] * 5                       # cmg_r, cmg_i, kf_r, kf_i, img
        out_specs = [coil_spec] * 5
        if accumulate_ssq:
            out_shape.append(jax.ShapeDtypeStruct((nc, H, Wp), jnp.float32))
            out_specs.append(pl.BlockSpec((1, H, Wp), lambda p, c: (p, 0, 0)))

        if nc > 1:
            semantics = (pltpu.CORE_PARALLEL, pltpu.ARBITRARY)
        else:
            semantics = ("arbitrary", "arbitrary")

        kernel = functools.partial(_cmg_post_kernel, cb=cb,
                                   accumulate_ssq=accumulate_ssq)
        grid_spec = pltpu.PrefetchScalarGridSpec(
            num_scalar_prefetch=0,
            grid=(nc, cpc // cb),
            in_specs=[out2_spec, coil_spec, coil_spec,
                      mat_h, mat_h, mat_h, mat_w, mat_w, mat_w],
            out_specs=out_specs,
        )
        return pl.pallas_call(
            kernel,
            out_shape=tuple(out_shape),
            grid_spec=grid_spec,
            compiler_params=pltpu.CompilerParams(
                dimension_semantics=semantics,
                vmem_limit_bytes=vmem_limit,
            ),
        )(out2, inp_r, inp_i, dhr, dhi, dhs, dwr, dwi, dws)

    nc = int(num_cores) if (int(num_cores) > 1 and C % int(num_cores) == 0) else 1
    if nc > 1:
        try:
            outs = build_and_run(nc)
        except Exception:
            nc = 1
            outs = build_and_run(1)
    else:
        outs = build_and_run(1)

    if Wp != W:
        cmg_r, cmg_i, kf_r, kf_i, img = (o[:, :, :W] for o in outs[:5])
    else:
        cmg_r, cmg_i, kf_r, kf_i, img = outs[:5]

    recons = {
        # TODO(synk): downstream consumers that accept planar (or bf16) complex data
        # could skip these interleaving stacks (each is an extra XLA pass over C planes).
        "kspace_recons": jnp.stack([kf_r, kf_i], axis=-1)[None],
        "cmg_recons": jnp.stack([cmg_r, cmg_i], axis=-1)[None],
        "img_recons": img[None],
    }

    if multicoil:
        res = int(resolution)
        h0 = (H - res) // 2
        w0 = (W - res) // 2
        if scalar_scale:
            ssq = outs[5]
            ssq = ssq[0] if nc == 1 else jnp.sum(ssq, axis=0)    # (H, Wp)
            crop = ssq[h0:h0 + res, w0:w0 + res]
            # rss = sqrt(sum_c (img_c*s)^2) == sqrt(sum_c (xr^2+xi^2) * s^2) for scalar s.
            recons["rss_recons"] = jnp.sqrt(crop * jnp.square(scale.reshape(())))
        else:
            # Per-coil / per-pixel cmg_scales: apply scale + RSS on the (small) cropped
            # img planes in XLA, matching the reference semantics exactly.
            crop = img[:, h0:h0 + res, w0:w0 + res][None] * scale
            recons["rss_recons"] = jnp.sqrt(jnp.sum(crop * crop, axis=1)).squeeze()
    return recons


def reference_forward(output, targets, extra_params, *,
                      challenge, output_mode, resolution):
    """Pure-JAX reference replicating the PyTorch forward semantics (cmg mode)."""
    cmg_target = jnp.asarray(targets["cmg_targets"], jnp.float32)
    B, C, H, W, _ = cmg_target.shape
    left = (output.shape[-1] - W) // 2
    x = jnp.asarray(output, jnp.float32)[..., left:left + W]
    cmg = jnp.transpose(x.reshape(B, C, 2, H, W), (0, 1, 3, 4, 2))
    cmg = cmg + jnp.asarray(targets["cmg_inputs"], jnp.float32)
    cc = cmg[..., 0] + 1j * cmg[..., 1]
    k = jnp.fft.fftshift(
        jnp.fft.fftn(jnp.fft.ifftshift(cc, axes=(-2, -1)), axes=(-2, -1), norm="ortho"),
        axes=(-2, -1))
    img = jnp.abs(cc)
    recons = {
        "kspace_recons": jnp.stack([k.real, k.imag], axis=-1),
        "cmg_recons": cmg,
        "img_recons": img,
    }
    if challenge == "multicoil":
        res = int(resolution)
        h0 = (H - res) // 2
        w0 = (W - res) // 2
        crop = img[..., h0:h0 + res, w0:w0 + res]
        crop = crop * jnp.asarray(extra_params["cmg_scales"], jnp.float32)
        recons["rss_recons"] = jnp.sqrt(jnp.sum(crop ** 2, axis=1)).squeeze()
    return recons


if __name__ == "__main__":
    key = jax.random.PRNGKey(0)
    k1, k2, k3 = jax.random.split(key, 3)

    # B=1 (module requirement), 8 coils, 16x16 image, network output width-padded to 24.
    B, C, H, W, Wpad = 1, 8, 16, 16, 24
    output = jax.random.normal(k1, (B, 2 * C, H, Wpad), jnp.float32)
    cmg_targets = jax.random.normal(k2, (B, C, H, W, 2), jnp.float32)
    cmg_inputs = jax.random.normal(k3, (B, C, H, W, 2), jnp.float32)

    targets = {"cmg_targets": cmg_targets, "cmg_inputs": cmg_inputs}
    extra_params = {"cmg_scales": jnp.float32(1.7)}
    cfg = dict(challenge="multicoil", output_mode="cmg", resolution=8)

    recons = post_process_cmg_img(output, targets, extra_params, **cfg)
    recons = jax.tree_util.tree_map(jax.block_until_ready, recons)

    ref = reference_forward(output, targets, extra_params, **cfg)

    # Elementwise-exact outputs (pure f32 VPU path in the kernel): tight tolerances.
    for name, tol in (("cmg_recons", 1e-5), ("img_recons", 1e-5), ("rss_recons", 1e-4)):
        np.testing.assert_allclose(np.asarray(recons[name]), np.asarray(ref[name]),
                                   atol=tol, rtol=tol, err_msg=name)

    # kspace goes through single-pass bf16 MXU matmuls (Karatsuba): use a
    # scale-independent, rtol-dominant check on the relative Frobenius error.
    got = np.asarray(recons["kspace_recons"], np.float64)
    want = np.asarray(ref["kspace_recons"], np.float64)
    rel_err = np.linalg.norm(got - want) / np.linalg.norm(want)
    assert rel_err < 5e-2, f"kspace relative error too large: {rel_err}"

    print("KERNEL_OK")
</pallas_src>

<mosaic_0001>
module attributes {stable_mosaic.version = 11 : i64} {
  func.func @_cmg_post_kernel(%arg0: i32, %arg1: i32, %arg2: memref<8x16x128xf32, #tpu.memory_space<vmem>>, %arg3: memref<4x16x128xf32, #tpu.memory_space<vmem>>, %arg4: memref<4x16x128xf32, #tpu.memory_space<vmem>>, %arg5: memref<16x16xbf16, #tpu.memory_space<vmem>>, %arg6: memref<16x16xbf16, #tpu.memory_space<vmem>>, %arg7: memref<16x16xbf16, #tpu.memory_space<vmem>>, %arg8: memref<128x128xbf16, #tpu.memory_space<vmem>>, %arg9: memref<128x128xbf16, #tpu.memory_space<vmem>>, %arg10: memref<128x128xbf16, #tpu.memory_space<vmem>>, %arg11: memref<4x16x128xf32, #tpu.memory_space<vmem>>, %arg12: memref<4x16x128xf32, #tpu.memory_space<vmem>>, %arg13: memref<4x16x128xf32, #tpu.memory_space<vmem>>, %arg14: memref<4x16x128xf32, #tpu.memory_space<vmem>>, %arg15: memref<4x16x128xf32, #tpu.memory_space<vmem>>, %arg16: memref<1x16x128xf32, #tpu.memory_space<vmem>>) attributes {dimension_semantics = [#tpu.dimension_semantics<arbitrary>, #tpu.dimension_semantics<arbitrary>], iteration_bounds = array<i64: 1, 2>, scalar_prefetch = 0 : i64, scratch_operands = 0 : i64, tpu.core_type = #tpu.core_type<tc>, window_params = [{transform_indices = @transform_0, window_bounds = array<i64: 8, 16, 128>}, {transform_indices = @transform_1, window_bounds = array<i64: 4, 16, 128>}, {transform_indices = @transform_2, window_bounds = array<i64: 4, 16, 128>}, {pipeline_mode = #tpu.pipeline_mode<synchronous>, transform_indices = @transform_3, window_bounds = array<i64: 16, 16>}, {pipeline_mode = #tpu.pipeline_mode<synchronous>, transform_indices = @transform_4, window_bounds = array<i64: 16, 16>}, {pipeline_mode = #tpu.pipeline_mode<synchronous>, transform_indices = @transform_5, window_bounds = array<i64: 16, 16>}, {pipeline_mode = #tpu.pipeline_mode<synchronous>, transform_indices = @transform_6, window_bounds = array<i64: 128, 128>}, {pipeline_mode = #tpu.pipeline_mode<synchronous>, transform_indices = @transform_7, window_bounds = array<i64: 128, 128>}, {pipeline_mode = #tpu.pipeline_mode<synchronous>, transform_indices = @transform_8, window_bounds = array<i64: 128, 128>}, {transform_indices = @transform_9, window_bounds = array<i64: 4, 16, 128>}, {transform_indices = @transform_10, window_bounds = array<i64: 4, 16, 128>}, {transform_indices = @transform_11, window_bounds = array<i64: 4, 16, 128>}, {transform_indices = @transform_12, window_bounds = array<i64: 4, 16, 128>}, {transform_indices = @transform_13, window_bounds = array<i64: 4, 16, 128>}, {transform_indices = @transform_14, window_bounds = array<i64: 1, 16, 128>}]} {
    %c0_i32 = arith.constant 0 : i32
    %0 = arith.cmpi eq, %arg1, %c0_i32 : i32
    %1 = arith.extui %0 : i1 to i32
    %c0_i32_0 = arith.constant 0 : i32
    %2 = arith.cmpi ne, %1, %c0_i32_0 : i32
    scf.if %2 {
      %cst_160 = arith.constant 0.000000e+00 : f32
      %229 = vector.broadcast %cst_160 : f32 to vector<1x16x128xf32>
      %c0_161 = arith.constant 0 : index
      %c0_162 = arith.constant 0 : index
      %c0_163 = arith.constant 0 : index
      %230 = vector.load %arg16[%c0_161, %c0_162, %c0_163] : memref<1x16x128xf32, #tpu.memory_space<vmem>>, vector<1x16x128xf32>
      tpu.vector_store %arg16[%c0_161, %c0_162, %c0_163], %229 {strides = array<i32>} : memref<1x16x128xf32, #tpu.memory_space<vmem>>, vector<1x16x128xf32>,
    } else {
    }
    %c0 = arith.constant 0 : index
    %c0_1 = arith.constant 0 : index
    %3 = vector.load %arg5[%c0, %c0_1] : memref<16x16xbf16, #tpu.memory_space<vmem>>, vector<16x16xbf16>
    %c0_2 = arith.constant 0 : index
    %c0_3 = arith.constant 0 : index
    %4 = vector.load %arg6[%c0_2, %c0_3] : memref<16x16xbf16, #tpu.memory_space<vmem>>, vector<16x16xbf16>
    %c0_4 = arith.constant 0 : index
    %c0_5 = arith.constant 0 : index
    %5 = vector.load %arg7[%c0_4, %c0_5] : memref<16x16xbf16, #tpu.memory_space<vmem>>, vector<16x16xbf16>
    %c0_6 = arith.constant 0 : index
    %c0_7 = arith.constant 0 : index
    %6 = vector.load %arg8[%c0_6, %c0_7] : memref<128x128xbf16, #tpu.memory_space<vmem>>, vector<128x128xbf16>
    %c0_8 = arith.constant 0 : index
    %c0_9 = arith.constant 0 : index
    %7 = vector.load %arg9[%c0_8, %c0_9] : memref<128x128xbf16, #tpu.memory_space<vmem>>, vector<128x128xbf16>
    %c0_10 = arith.constant 0 : index
    %c0_11 = arith.constant 0 : index
    %8 = vector.load %arg10[%c0_10, %c0_11] : memref<128x128xbf16, #tpu.memory_space<vmem>>, vector<128x128xbf16>
    %c0_12 = arith.constant 0 : index
    %c0_13 = arith.constant 0 : index
    %c0_14 = arith.constant 0 : index
    %9 = vector.load %arg2[%c0_12, %c0_13, %c0_14] : memref<8x16x128xf32, #tpu.memory_space<vmem>>, vector<1x16x128xf32>
    %10 = vector.shape_cast %9 : vector<1x16x128xf32> to vector<16x128xf32>
    %c0_15 = arith.constant 0 : index
    %c0_16 = arith.constant 0 : index
    %c0_17 = arith.constant 0 : index
    %11 = vector.load %arg3[%c0_15, %c0_16, %c0_17] : memref<4x16x128xf32, #tpu.memory_space<vmem>>, vector<1x16x128xf32>
    %12 = vector.shape_cast %11 : vector<1x16x128xf32> to vector<16x128xf32>
    %13 = arith.addf %10, %12 : vector<16x128xf32>
    %c1 = arith.constant 1 : index
    %c0_18 = arith.constant 0 : index
    %c0_19 = arith.constant 0 : index
    %14 = vector.load %arg2[%c1, %c0_18, %c0_19] : memref<8x16x128xf32, #tpu.memory_space<vmem>>, vector<1x16x128xf32>
    %15 = vector.shape_cast %14 : vector<1x16x128xf32> to vector<16x128xf32>
    %c0_20 = arith.constant 0 : index
    %c0_21 = arith.constant 0 : index
    %c0_22 = arith.constant 0 : index
    %16 = vector.load %arg4[%c0_20, %c0_21, %c0_22] : memref<4x16x128xf32, #tpu.memory_space<vmem>>, vector<1x16x128xf32>
    %17 = vector.shape_cast %16 : vector<1x16x128xf32> to vector<16x128xf32>
    %18 = arith.addf %15, %17 : vector<16x128xf32>
    %c0_23 = arith.constant 0 : index
    %c0_24 = arith.constant 0 : index
    %c0_25 = arith.constant 0 : index
    %19 = vector.load %arg11[%c0_23, %c0_24, %c0_25] : memref<4x16x128xf32, #tpu.memory_space<vmem>>, vector<1x16x128xf32>
    %20 = vector.shape_cast %19 : vector<1x16x128xf32> to vector<16x128xf32>
    %21 = vector.shape_cast %13 : vector<16x128xf32> to vector<1x16x128xf32>
    tpu.vector_store %arg11[%c0_23, %c0_24, %c0_25], %21 {strides = array<i32>} : memref<4x16x128xf32, #tpu.memory_space<vmem>>, vector<1x16x128xf32>,
    %c0_26 = arith.constant 0 : index
    %c0_27 = arith.constant 0 : index
    %c0_28 = arith.constant 0 : index
    %22 = vector.load %arg12[%c0_26, %c0_27, %c0_28] : memref<4x16x128xf32, #tpu.memory_space<vmem>>, vector<1x16x128xf32>
    %23 = vector.shape_cast %22 : vector<1x16x128xf32> to vector<16x128xf32>
    %24 = vector.shape_cast %18 : vector<16x128xf32> to vector<1x16x128xf32>
    tpu.vector_store %arg12[%c0_26, %c0_27, %c0_28], %24 {strides = array<i32>} : memref<4x16x128xf32, #tpu.memory_space<vmem>>, vector<1x16x128xf32>,
    %25 = arith.mulf %13, %13 : vector<16x128xf32>
    %26 = arith.mulf %18, %18 : vector<16x128xf32>
    %27 = arith.addf %25, %26 : vector<16x128xf32>
    %28 = math.sqrt %27 : vector<16x128xf32>
    %c0_29 = arith.constant 0 : index
    %c0_30 = arith.constant 0 : index
    %c0_31 = arith.constant 0 : index
    %29 = vector.load %arg15[%c0_29, %c0_30, %c0_31] : memref<4x16x128xf32, #tpu.memory_space<vmem>>, vector<1x16x128xf32>
    %30 = vector.shape_cast %29 : vector<1x16x128xf32> to vector<16x128xf32>
    %31 = vector.shape_cast %28 : vector<16x128xf32> to vector<1x16x128xf32>
    tpu.vector_store %arg15[%c0_29, %c0_30, %c0_31], %31 {strides = array<i32>} : memref<4x16x128xf32, #tpu.memory_space<vmem>>, vector<1x16x128xf32>,
    %c0_32 = arith.constant 0 : index
    %c0_33 = arith.constant 0 : index
    %c0_34 = arith.constant 0 : index
    %32 = vector.load %arg16[%c0_32, %c0_33, %c0_34] : memref<1x16x128xf32, #tpu.memory_space<vmem>>, vector<1x16x128xf32>
    %33 = vector.shape_cast %32 : vector<1x16x128xf32> to vector<16x128xf32>
    %34 = arith.addf %33, %27 : vector<16x128xf32>
    %c0_35 = arith.constant 0 : index
    %c0_36 = arith.constant 0 : index
    %c0_37 = arith.constant 0 : index
    %35 = vector.load %arg16[%c0_35, %c0_36, %c0_37] : memref<1x16x128xf32, #tpu.memory_space<vmem>>, vector<1x16x128xf32>
    %36 = vector.shape_cast %35 : vector<1x16x128xf32> to vector<16x128xf32>
    %37 = vector.shape_cast %34 : vector<16x128xf32> to vector<1x16x128xf32>
    tpu.vector_store %arg16[%c0_35, %c0_36, %c0_37], %37 {strides = array<i32>} : memref<1x16x128xf32, #tpu.memory_space<vmem>>, vector<1x16x128xf32>,
    %38 = arith.truncf %13 : vector<16x128xf32> to vector<16x128xbf16>
    %39 = arith.truncf %18 : vector<16x128xf32> to vector<16x128xbf16>
    %40 = arith.addf %13, %18 : vector<16x128xf32>
    %41 = arith.truncf %40 : vector<16x128xf32> to vector<16x128xbf16>
    %cst = arith.constant dense<0.000000e+00> : vector<16x128xf32>
    %42 = tpu.matmul %3, %38, %cst {dimension_numbers = #tpu.dot_dimension_numbers<[1], [0], [0], [1], [0, 0, 1, 1], [], []>} : vector<16x16xbf16>, vector<16x128xbf16>, vector<16x128xf32> -> vector<16x128xf32>
    %cst_38 = arith.constant dense<0.000000e+00> : vector<16x128xf32>
    %43 = tpu.matmul %4, %39, %cst_38 {dimension_numbers = #tpu.dot_dimension_numbers<[1], [0], [0], [1], [0, 0, 1, 1], [], []>} : vector<16x16xbf16>, vector<16x128xbf16>, vector<16x128xf32> -> vector<16x128xf32>
    %cst_39 = arith.constant dense<0.000000e+00> : vector<16x128xf32>
    %44 = tpu.matmul %5, %41, %cst_39 {dimension_numbers = #tpu.dot_dimension_numbers<[1], [0], [0], [1], [0, 0, 1, 1], [], []>} : vector<16x16xbf16>, vector<16x128xbf16>, vector<16x128xf32> -> vector<16x128xf32>
    %45 = arith.subf %42, %43 : vector<16x128xf32>
    %46 = arith.subf %44, %42 : vector<16x128xf32>
    %47 = arith.subf %46, %43 : vector<16x128xf32>
    %48 = arith.truncf %45 : vector<16x128xf32> to vector<16x128xbf16>
    %49 = arith.truncf %47 : vector<16x128xf32> to vector<16x128xbf16>
    %50 = arith.addf %45, %47 : vector<16x128xf32>
    %51 = arith.truncf %50 : vector<16x128xf32> to vector<16x128xbf16>
    %cst_40 = arith.constant dense<0.000000e+00> : vector<16x128xf32>
    %52 = tpu.matmul %48, %6, %cst_40 {dimension_numbers = #tpu.dot_dimension_numbers<[1], [0], [0], [1], [0, 0, 1, 1], [], []>} : vector<16x128xbf16>, vector<128x128xbf16>, vector<16x128xf32> -> vector<16x128xf32>
    %cst_41 = arith.constant dense<0.000000e+00> : vector<16x128xf32>
    %53 = tpu.matmul %49, %7, %cst_41 {dimension_numbers = #tpu.dot_dimension_numbers<[1], [0], [0], [1], [0, 0, 1, 1], [], []>} : vector<16x128xbf16>, vector<128x128xbf16>, vector<16x128xf32> -> vector<16x128xf32>
    %cst_42 = arith.constant dense<0.000000e+00> : vector<16x128xf32>
    %54 = tpu.matmul %51, %8, %cst_42 {dimension_numbers = #tpu.dot_dimension_numbers<[1], [0], [0], [1], [0, 0, 1, 1], [], []>} : vector<16x128xbf16>, vector<128x128xbf16>, vector<16x128xf32> -> vector<16x128xf32>
    %55 = arith.subf %52, %53 : vector<16x128xf32>
    %c0_43 = arith.constant 0 : index
    %c0_44 = arith.constant 0 : index
    %c0_45 = arith.constant 0 : index
    %56 = vector.load %arg13[%c0_43, %c0_44, %c0_45] : memref<4x16x128xf32, #tpu.memory_space<vmem>>, vector<1x16x128xf32>
    %57 = vector.shape_cast %56 : vector<1x16x128xf32> to vector<16x128xf32>
    %58 = vector.shape_cast %55 : vector<16x128xf32> to vector<1x16x128xf32>
    tpu.vector_store %arg13[%c0_43, %c0_44, %c0_45], %58 {strides = array<i32>} : memref<4x16x128xf32, #tpu.memory_space<vmem>>, vector<1x16x128xf32>,
    %59 = arith.subf %54, %52 : vector<16x128xf32>
    %60 = arith.subf %59, %53 : vector<16x128xf32>
    %c0_46 = arith.constant 0 : index
    %c0_47 = arith.constant 0 : index
    %c0_48 = arith.constant 0 : index
    %61 = vector.load %arg14[%c0_46, %c0_47, %c0_48] : memref<4x16x128xf32, #tpu.memory_space<vmem>>, vector<1x16x128xf32>
    %62 = vector.shape_cast %61 : vector<1x16x128xf32> to vector<16x128xf32>
    %63 = vector.shape_cast %60 : vector<16x128xf32> to vector<1x16x128xf32>
    tpu.vector_store %arg14[%c0_46, %c0_47, %c0_48], %63 {strides = array<i32>} : memref<4x16x128xf32, #tpu.memory_space<vmem>>, vector<1x16x128xf32>,
    %c2 = arith.constant 2 : index
    %c0_49 = arith.constant 0 : index
    %c0_50 = arith.constant 0 : index
    %64 = vector.load %arg2[%c2, %c0_49, %c0_50] : memref<8x16x128xf32, #tpu.memory_space<vmem>>, vector<1x16x128xf32>
    %65 = vector.shape_cast %64 : vector<1x16x128xf32> to vector<16x128xf32>
    %c1_51 = arith.constant 1 : index
    %c0_52 = arith.constant 0 : index
    %c0_53 = arith.constant 0 : index
    %66 = vector.load %arg3[%c1_51, %c0_52, %c0_53] : memref<4x16x128xf32, #tpu.memory_space<vmem>>, vector<1x16x128xf32>
    %67 = vector.shape_cast %66 : vector<1x16x128xf32> to vector<16x128xf32>
    %68 = arith.addf %65, %67 : vector<16x128xf32>
    %c3 = arith.constant 3 : index
    %c0_54 = arith.constant 0 : index
    %c0_55 = arith.constant 0 : index
    %69 = vector.load %arg2[%c3, %c0_54, %c0_55] : memref<8x16x128xf32, #tpu.memory_space<vmem>>, vector<1x16x128xf32>
    %70 = vector.shape_cast %69 : vector<1x16x128xf32> to vector<16x128xf32>
    %c1_56 = arith.constant 1 : index
    %c0_57 = arith.constant 0 : index
    %c0_58 = arith.constant 0 : index
    %71 = vector.load %arg4[%c1_56, %c0_57, %c0_58] : memref<4x16x128xf32, #tpu.memory_space<vmem>>, vector<1x16x128xf32>
    %72 = vector.shape_cast %71 : vector<1x16x128xf32> to vector<16x128xf32>
    %73 = arith.addf %70, %72 : vector<16x128xf32>
    %c1_59 = arith.constant 1 : index
    %c0_60 = arith.constant 0 : index
    %c0_61 = arith.constant 0 : index
    %74 = vector.load %arg11[%c1_59, %c0_60, %c0_61] : memref<4x16x128xf32, #tpu.memory_space<vmem>>, vector<1x16x128xf32>
    %75 = vector.shape_cast %74 : vector<1x16x128xf32> to vector<16x128xf32>
    %76 = vector.shape_cast %68 : vector<16x128xf32> to vector<1x16x128xf32>
    tpu.vector_store %arg11[%c1_59, %c0_60, %c0_61], %76 {strides = array<i32>} : memref<4x16x128xf32, #tpu.memory_space<vmem>>, vector<1x16x128xf32>,
    %c1_62 = arith.constant 1 : index
    %c0_63 = arith.constant 0 : index
    %c0_64 = arith.constant 0 : index
    %77 = vector.load %arg12[%c1_62, %c0_63, %c0_64] : memref<4x16x128xf32, #tpu.memory_space<vmem>>, vector<1x16x128xf32>
    %78 = vector.shape_cast %77 : vector<1x16x128xf32> to vector<16x128xf32>
    %79 = vector.shape_cast %73 : vector<16x128xf32> to vector<1x16x128xf32>
    tpu.vector_store %arg12[%c1_62, %c0_63, %c0_64], %79 {strides = array<i32>} : memref<4x16x128xf32, #tpu.memory_space<vmem>>, vector<1x16x128xf32>,
    %80 = arith.mulf %68, %68 : vector<16x128xf32>
    %81 = arith.mulf %73, %73 : vector<16x128xf32>
    %82 = arith.addf %80, %81 : vector<16x128xf32>
    %83 = math.sqrt %82 : vector<16x128xf32>
    %c1_65 = arith.constant 1 : index
    %c0_66 = arith.constant 0 : index
    %c0_67 = arith.constant 0 : index
    %84 = vector.load %arg15[%c1_65, %c0_66, %c0_67] : memref<4x16x128xf32, #tpu.memory_space<vmem>>, vector<1x16x128xf32>
    %85 = vector.shape_cast %84 : vector<1x16x128xf32> to vector<16x128xf32>
    %86 = vector.shape_cast %83 : vector<16x128xf32> to vector<1x16x128xf32>
    tpu.vector_store %arg15[%c1_65, %c0_66, %c0_67], %86 {strides = array<i32>} : memref<4x16x128xf32, #tpu.memory_space<vmem>>, vector<1x16x128xf32>,
    %c0_68 = arith.constant 0 : index
    %c0_69 = arith.constant 0 : index
    %c0_70 = arith.constant 0 : index
    %87 = vector.load %arg16[%c0_68, %c0_69, %c0_70] : memref<1x16x128xf32, #tpu.memory_space<vmem>>, vector<1x16x128xf32>
    %88 = vector.shape_cast %87 : vector<1x16x128xf32> to vector<16x128xf32>
    %89 = arith.addf %88, %82 : vector<16x128xf32>
    %c0_71 = arith.constant 0 : index
    %c0_72 = arith.constant 0 : index
    %c0_73 = arith.constant 0 : index
    %90 = vector.load %arg16[%c0_71, %c0_72, %c0_73] : memref<1x16x128xf32, #tpu.memory_space<vmem>>, vector<1x16x128xf32>
    %91 = vector.shape_cast %90 : vector<1x16x128xf32> to vector<16x128xf32>
    %92 = vector.shape_cast %89 : vector<16x128xf32> to vector<1x16x128xf32>
    tpu.vector_store %arg16[%c0_71, %c0_72, %c0_73], %92 {strides = array<i32>} : memref<1x16x128xf32, #tpu.memory_space<vmem>>, vector<1x16x128xf32>,
    %93 = arith.truncf %68 : vector<16x128xf32> to vector<16x128xbf16>
    %94 = arith.truncf %73 : vector<16x128xf32> to vector<16x128xbf16>
    %95 = arith.addf %68, %73 : vector<16x128xf32>
    %96 = arith.truncf %95 : vector<16x128xf32> to vector<16x128xbf16>
    %cst_74 = arith.constant dense<0.000000e+00> : vector<16x128xf32>
    %97 = tpu.matmul %3, %93, %cst_74 {dimension_numbers = #tpu.dot_dimension_numbers<[1], [0], [0], [1], [0, 0, 1, 1], [], []>} : vector<16x16xbf16>, vector<16x128xbf16>, vector<16x128xf32> -> vector<16x128xf32>
    %cst_75 = arith.constant dense<0.000000e+00> : vector<16x128xf32>
    %98 = tpu.matmul %4, %94, %cst_75 {dimension_numbers = #tpu.dot_dimension_numbers<[1], [0], [0], [1], [0, 0, 1, 1], [], []>} : vector<16x16xbf16>, vector<16x128xbf16>, vector<16x128xf32> -> vector<16x128xf32>
    %cst_76 = arith.constant dense<0.000000e+00> : vector<16x128xf32>
    %99 = tpu.matmul %5, %96, %cst_76 {dimension_numbers = #tpu.dot_dimension_numbers<[1], [0], [0], [1], [0, 0, 1, 1], [], []>} : vector<16x16xbf16>, vector<16x128xbf16>, vector<16x128xf32> -> vector<16x128xf32>
    %100 = arith.subf %97, %98 : vector<16x128xf32>
    %101 = arith.subf %99, %97 : vector<16x128xf32>
    %102 = arith.subf %101, %98 : vector<16x128xf32>
    %103 = arith.truncf %100 : vector<16x128xf32> to vector<16x128xbf16>
    %104 = arith.truncf %102 : vector<16x128xf32> to vector<16x128xbf16>
    %105 = arith.addf %100, %102 : vector<16x128xf32>
    %106 = arith.truncf %105 : vector<16x128xf32> to vector<16x128xbf16>
    %cst_77 = arith.constant dense<0.000000e+00> : vector<16x128xf32>
    %107 = tpu.matmul %103, %6, %cst_77 {dimension_numbers = #tpu.dot_dimension_numbers<[1], [0], [0], [1], [0, 0, 1, 1], [], []>} : vector<16x128xbf16>, vector<128x128xbf16>, vector<16x128xf32> -> vector<16x128xf32>
    %cst_78 = arith.constant dense<0.000000e+00> : vector<16x128xf32>
    %108 = tpu.matmul %104, %7, %cst_78 {dimension_numbers = #tpu.dot_dimension_numbers<[1], [0], [0], [1], [0, 0, 1, 1], [], []>} : vector<16x128xbf16>, vector<128x128xbf16>, vector<16x128xf32> -> vector<16x128xf32>
    %cst_79 = arith.constant dense<0.000000e+00> : vector<16x128xf32>
    %109 = tpu.matmul %106, %8, %cst_79 {dimension_numbers = #tpu.dot_dimension_numbers<[1], [0], [0], [1], [0, 0, 1, 1], [], []>} : vector<16x128xbf16>, vector<128x128xbf16>, vector<16x128xf32> -> vector<16x128xf32>
    %110 = arith.subf %107, %108 : vector<16x128xf32>
    %c1_80 = arith.constant 1 : index
    %c0_81 = arith.constant 0 : index
    %c0_82 = arith.constant 0 : index
    %111 = vector.load %arg13[%c1_80, %c0_81, %c0_82] : memref<4x16x128xf32, #tpu.memory_space<vmem>>, vector<1x16x128xf32>
    %112 = vector.shape_cast %111 : vector<1x16x128xf32> to vector<16x128xf32>
    %113 = vector.shape_cast %110 : vector<16x128xf32> to vector<1x16x128xf32>
    tpu.vector_store %arg13[%c1_80, %c0_81, %c0_82], %113 {strides = array<i32>} : memref<4x16x128xf32, #tpu.memory_space<vmem>>, vector<1x16x128xf32>,
    %114 = arith.subf %109, %107 : vector<16x128xf32>
    %115 = arith.subf %114, %108 : vector<16x128xf32>
    %c1_83 = arith.constant 1 : index
    %c0_84 = arith.constant 0 : index
    %c0_85 = arith.constant 0 : index
    %116 = vector.load %arg14[%c1_83, %c0_84, %c0_85] : memref<4x16x128xf32, #tpu.memory_space<vmem>>, vector<1x16x128xf32>
    %117 = vector.shape_cast %116 : vector<1x16x128xf32> to vector<16x128xf32>
    %118 = vector.shape_cast %115 : vector<16x128xf32> to vector<1x16x128xf32>
    tpu.vector_store %arg14[%c1_83, %c0_84, %c0_85], %118 {strides = array<i32>} : memref<4x16x128xf32, #tpu.memory_space<vmem>>, vector<1x16x128xf32>,
    %c4 = arith.constant 4 : index
    %c0_86 = arith.constant 0 : index
    %c0_87 = arith.constant 0 : index
    %119 = vector.load %arg2[%c4, %c0_86, %c0_87] : memref<8x16x128xf32, #tpu.memory_space<vmem>>, vector<1x16x128xf32>
    %120 = vector.shape_cast %119 : vector<1x16x128xf32> to vector<16x128xf32>
    %c2_88 = arith.constant 2 : index
    %c0_89 = arith.constant 0 : index
    %c0_90 = arith.constant 0 : index
    %121 = vector.load %arg3[%c2_88, %c0_89, %c0_90] : memref<4x16x128xf32, #tpu.memory_space<vmem>>, vector<1x16x128xf32>
    %122 = vector.shape_cast %121 : vector<1x16x128xf32> to vector<16x128xf32>
    %123 = arith.addf %120, %122 : vector<16x128xf32>
    %c5 = arith.constant 5 : index
    %c0_91 = arith.constant 0 : index
    %c0_92 = arith.constant 0 : index
    %124 = vector.load %arg2[%c5, %c0_91, %c0_92] : memref<8x16x128xf32, #tpu.memory_space<vmem>>, vector<1x16x128xf32>
    %125 = vector.shape_cast %124 : vector<1x16x128xf32> to vector<16x128xf32>
    %c2_93 = arith.constant 2 : index
    %c0_94 = arith.constant 0 : index
    %c0_95 = arith.constant 0 : index
    %126 = vector.load %arg4[%c2_93, %c0_94, %c0_95] : memref<4x16x128xf32, #tpu.memory_space<vmem>>, vector<1x16x128xf32>
    %127 = vector.shape_cast %126 : vector<1x16x128xf32> to vector<16x128xf32>
    %128 = arith.addf %125, %127 : vector<16x128xf32>
    %c2_96 = arith.constant 2 : index
    %c0_97 = arith.constant 0 : index
    %c0_98 = arith.constant 0 : index
    %129 = vector.load %arg11[%c2_96, %c0_97, %c0_98] : memref<4x16x128xf32, #tpu.memory_space<vmem>>, vector<1x16x128xf32>
    %130 = vector.shape_cast %129 : vector<1x16x128xf32> to vector<16x128xf32>
    %131 = vector.shape_cast %123 : vector<16x128xf32> to vector<1x16x128xf32>
    tpu.vector_store %arg11[%c2_96, %c0_97, %c0_98], %131 {strides = array<i32>} : memref<4x16x128xf32, #tpu.memory_space<vmem>>, vector<1x16x128xf32>,
    %c2_99 = arith.constant 2 : index
    %c0_100 = arith.constant 0 : index
    %c0_101 = arith.constant 0 : index
    %132 = vector.load %arg12[%c2_99, %c0_100, %c0_101] : memref<4x16x128xf32, #tpu.memory_space<vmem>>, vector<1x16x128xf32>
    %133 = vector.shape_cast %132 : vector<1x16x128xf32> to vector<16x128xf32>
    %134 = vector.shape_cast %128 : vector<16x128xf32> to vector<1x16x128xf32>
    tpu.vector_store %arg12[%c2_99, %c0_100, %c0_101], %134 {strides = array<i32>} : memref<4x16x128xf32, #tpu.memory_space<vmem>>, vector<1x16x128xf32>,
    %135 = arith.mulf %123, %123 : vector<16x128xf32>
    %136 = arith.mulf %128, %128 : vector<16x128xf32>
    %137 = arith.addf %135, %136 : vector<16x128xf32>
    %138 = math.sqrt %137 : vector<16x128xf32>
    %c2_102 = arith.constant 2 : index
    %c0_103 = arith.constant 0 : index
    %c0_104 = arith.constant 0 : index
    %139 = vector.load %arg15[%c2_102, %c0_103, %c0_104] : memref<4x16x128xf32, #tpu.memory_space<vmem>>, vector<1x16x128xf32>
    %140 = vector.shape_cast %139 : vector<1x16x128xf32> to vector<16x128xf32>
    %141 = vector.shape_cast %138 : vector<16x128xf32> to vector<1x16x128xf32>
    tpu.vector_store %arg15[%c2_102, %c0_103, %c0_104], %141 {strides = array<i32>} : memref<4x16x128xf32, #tpu.memory_space<vmem>>, vector<1x16x128xf32>,
    %c0_105 = arith.constant 0 : index
    %c0_106 = arith.constant 0 : index
    %c0_107 = arith.constant 0 : index
    %142 = vector.load %arg16[%c0_105, %c0_106, %c0_107] : memref<1x16x128xf32, #tpu.memory_space<vmem>>, vector<1x16x128xf32>
    %143 = vector.shape_cast %142 : vector<1x16x128xf32> to vector<16x128xf32>
    %144 = arith.addf %143, %137 : vector<16x128xf32>
    %c0_108 = arith.constant 0 : index
    %c0_109 = arith.constant 0 : index
    %c0_110 = arith.constant 0 : index
    %145 = vector.load %arg16[%c0_108, %c0_109, %c0_110] : memref<1x16x128xf32, #tpu.memory_space<vmem>>, vector<1x16x128xf32>
    %146 = vector.shape_cast %145 : vector<1x16x128xf32> to vector<16x128xf32>
    %147 = vector.shape_cast %144 : vector<16x128xf32> to vector<1x16x128xf32>
    tpu.vector_store %arg16[%c0_108, %c0_109, %c0_110], %147 {strides = array<i32>} : memref<1x16x128xf32, #tpu.memory_space<vmem>>, vector<1x16x128xf32>,
    %148 = arith.truncf %123 : vector<16x128xf32> to vector<16x128xbf16>
    %149 = arith.truncf %128 : vector<16x128xf32> to vector<16x128xbf16>
    %150 = arith.addf %123, %128 : vector<16x128xf32>
    %151 = arith.truncf %150 : vector<16x128xf32> to vector<16x128xbf16>
    %cst_111 = arith.constant dense<0.000000e+00> : vector<16x128xf32>
    %152 = tpu.matmul %3, %148, %cst_111 {dimension_numbers = #tpu.dot_dimension_numbers<[1], [0], [0], [1], [0, 0, 1, 1], [], []>} : vector<16x16xbf16>, vector<16x128xbf16>, vector<16x128xf32> -> vector<16x128xf32>
    %cst_112 = arith.constant dense<0.000000e+00> : vector<16x128xf32>
    %153 = tpu.matmul %4, %149, %cst_112 {dimension_numbers = #tpu.dot_dimension_numbers<[1], [0], [0], [1], [0, 0, 1, 1], [], []>} : vector<16x16xbf16>, vector<16x128xbf16>, vector<16x128xf32> -> vector<16x128xf32>
    %cst_113 = arith.constant dense<0.000000e+00> : vector<16x128xf32>
    %154 = tpu.matmul %5, %151, %cst_113 {dimension_numbers = #tpu.dot_dimension_numbers<[1], [0], [0], [1], [0, 0, 1, 1], [], []>} : vector<16x16xbf16>, vector<16x128xbf16>, vector<16x128xf32> -> vector<16x128xf32>
    %155 = arith.subf %152, %153 : vector<16x128xf32>
    %156 = arith.subf %154, %152 : vector<16x128xf32>
    %157 = arith.subf %156, %153 : vector<16x128xf32>
    %158 = arith.truncf %155 : vector<16x128xf32> to vector<16x128xbf16>
    %159 = arith.truncf %157 : vector<16x128xf32> to vector<16x128xbf16>
    %160 = arith.addf %155, %157 : vector<16x128xf32>
    %161 = arith.truncf %160 : vector<16x128xf32> to vector<16x128xbf16>
    %cst_114 = arith.constant dense<0.000000e+00> : vector<16x128xf32>
    %162 = tpu.matmul %158, %6, %cst_114 {dimension_numbers = #tpu.dot_dimension_numbers<[1], [0], [0], [1], [0, 0, 1, 1], [], []>} : vector<16x128xbf16>, vector<128x128xbf16>, vector<16x128xf32> -> vector<16x128xf32>
    %cst_115 = arith.constant dense<0.000000e+00> : vector<16x128xf32>
    %163 = tpu.matmul %159, %7, %cst_115 {dimension_numbers = #tpu.dot_dimension_numbers<[1], [0], [0], [1], [0, 0, 1, 1], [], []>} : vector<16x128xbf16>, vector<128x128xbf16>, vector<16x128xf32> -> vector<16x128xf32>
    %cst_116 = arith.constant dense<0.000000e+00> : vector<16x128xf32>
    %164 = tpu.matmul %161, %8, %cst_116 {dimension_numbers = #tpu.dot_dimension_numbers<[1], [0], [0], [1], [0, 0, 1, 1], [], []>} : vector<16x128xbf16>, vector<128x128xbf16>, vector<16x128xf32> -> vector<16x128xf32>
    %165 = arith.subf %162, %163 : vector<16x128xf32>
    %c2_117 = arith.constant 2 : index
    %c0_118 = arith.constant 0 : index
    %c0_119 = arith.constant 0 : index
    %166 = vector.load %arg13[%c2_117, %c0_118, %c0_119] : memref<4x16x128xf32, #tpu.memory_space<vmem>>, vector<1x16x128xf32>
    %167 = vector.shape_cast %166 : vector<1x16x128xf32> to vector<16x128xf32>
    %168 = vector.shape_cast %165 : vector<16x128xf32> to vector<1x16x128xf32>
    tpu.vector_store %arg13[%c2_117, %c0_118, %c0_119], %168 {strides = array<i32>} : memref<4x16x128xf32, #tpu.memory_space<vmem>>, vector<1x16x128xf32>,
    %169 = arith.subf %164, %162 : vector<16x128xf32>
    %170 = arith.subf %169, %163 : vector<16x128xf32>
    %c2_120 = arith.constant 2 : index
    %c0_121 = arith.constant 0 : index
    %c0_122 = arith.constant 0 : index
    %171 = vector.load %arg14[%c2_120, %c0_121, %c0_122] : memref<4x16x128xf32, #tpu.memory_space<vmem>>, vector<1x16x128xf32>
    %172 = vector.shape_cast %171 : vector<1x16x128xf32> to vector<16x128xf32>
    %173 = vector.shape_cast %170 : vector<16x128xf32> to vector<1x16x128xf32>
    tpu.vector_store %arg14[%c2_120, %c0_121, %c0_122], %173 {strides = array<i32>} : memref<4x16x128xf32, #tpu.memory_space<vmem>>, vector<1x16x128xf32>,
    %c6 = arith.constant 6 : index
    %c0_123 = arith.constant 0 : index
    %c0_124 = arith.constant 0 : index
    %174 = vector.load %arg2[%c6, %c0_123, %c0_124] : memref<8x16x128xf32, #tpu.memory_space<vmem>>, vector<1x16x128xf32>
    %175 = vector.shape_cast %174 : vector<1x16x128xf32> to vector<16x128xf32>
    %c3_125 = arith.constant 3 : index
    %c0_126 = arith.constant 0 : index
    %c0_127 = arith.constant 0 : index
    %176 = vector.load %arg3[%c3_125, %c0_126, %c0_127] : memref<4x16x128xf32, #tpu.memory_space<vmem>>, vector<1x16x128xf32>
    %177 = vector.shape_cast %176 : vector<1x16x128xf32> to vector<16x128xf32>
    %178 = arith.addf %175, %177 : vector<16x128xf32>
    %c7 = arith.constant 7 : index
    %c0_128 = arith.constant 0 : index
    %c0_129 = arith.constant 0 : index
    %179 = vector.load %arg2[%c7, %c0_128, %c0_129] : memref<8x16x128xf32, #tpu.memory_space<vmem>>, vector<1x16x128xf32>
    %180 = vector.shape_cast %179 : vector<1x16x128xf32> to vector<16x128xf32>
    %c3_130 = arith.constant 3 : index
    %c0_131 = arith.constant 0 : index
    %c0_132 = arith.constant 0 : index
    %181 = vector.load %arg4[%c3_130, %c0_131, %c0_132] : memref<4x16x128xf32, #tpu.memory_space<vmem>>, vector<1x16x128xf32>
    %182 = vector.shape_cast %181 : vector<1x16x128xf32> to vector<16x128xf32>
    %183 = arith.addf %180, %182 : vector<16x128xf32>
    %c3_133 = arith.constant 3 : index
    %c0_134 = arith.constant 0 : index
    %c0_135 = arith.constant 0 : index
    %184 = vector.load %arg11[%c3_133, %c0_134, %c0_135] : memref<4x16x128xf32, #tpu.memory_space<vmem>>, vector<1x16x128xf32>
    %185 = vector.shape_cast %184 : vector<1x16x128xf32> to vector<16x128xf32>
    %186 = vector.shape_cast %178 : vector<16x128xf32> to vector<1x16x128xf32>
    tpu.vector_store %arg11[%c3_133, %c0_134, %c0_135], %186 {strides = array<i32>} : memref<4x16x128xf32, #tpu.memory_space<vmem>>, vector<1x16x128xf32>,
    %c3_136 = arith.constant 3 : index
    %c0_137 = arith.constant 0 : index
    %c0_138 = arith.constant 0 : index
    %187 = vector.load %arg12[%c3_136, %c0_137, %c0_138] : memref<4x16x128xf32, #tpu.memory_space<vmem>>, vector<1x16x128xf32>
    %188 = vector.shape_cast %187 : vector<1x16x128xf32> to vector<16x128xf32>
    %189 = vector.shape_cast %183 : vector<16x128xf32> to vector<1x16x128xf32>
    tpu.vector_store %arg12[%c3_136, %c0_137, %c0_138], %189 {strides = array<i32>} : memref<4x16x128xf32, #tpu.memory_space<vmem>>, vector<1x16x128xf32>,
    %190 = arith.mulf %178, %178 : vector<16x128xf32>
    %191 = arith.mulf %183, %183 : vector<16x128xf32>
    %192 = arith.addf %190, %191 : vector<16x128xf32>
    %193 = math.sqrt %192 : vector<16x128xf32>
    %c3_139 = arith.constant 3 : index
    %c0_140 = arith.constant 0 : index
    %c0_141 = arith.constant 0 : index
    %194 = vector.load %arg15[%c3_139, %c0_140, %c0_141] : memref<4x16x128xf32, #tpu.memory_space<vmem>>, vector<1x16x128xf32>
    %195 = vector.shape_cast %194 : vector<1x16x128xf32> to vector<16x128xf32>
    %196 = vector.shape_cast %193 : vector<16x128xf32> to vector<1x16x128xf32>
    tpu.vector_store %arg15[%c3_139, %c0_140, %c0_141], %196 {strides = array<i32>} : memref<4x16x128xf32, #tpu.memory_space<vmem>>, vector<1x16x128xf32>,
    %c0_142 = arith.constant 0 : index
    %c0_143 = arith.constant 0 : index
    %c0_144 = arith.constant 0 : index
    %197 = vector.load %arg16[%c0_142, %c0_143, %c0_144] : memref<1x16x128xf32, #tpu.memory_space<vmem>>, vector<1x16x128xf32>
    %198 = vector.shape_cast %197 : vector<1x16x128xf32> to vector<16x128xf32>
    %199 = arith.addf %198, %192 : vector<16x128xf32>
    %c0_145 = arith.constant 0 : index
    %c0_146 = arith.constant 0 : index
    %c0_147 = arith.constant 0 : index
    %200 = vector.load %arg16[%c0_145, %c0_146, %c0_147] : memref<1x16x128xf32, #tpu.memory_space<vmem>>, vector<1x16x128xf32>
    %201 = vector.shape_cast %200 : vector<1x16x128xf32> to vector<16x128xf32>
    %202 = vector.shape_cast %199 : vector<16x128xf32> to vector<1x16x128xf32>
    tpu.vector_store %arg16[%c0_145, %c0_146, %c0_147], %202 {strides = array<i32>} : memref<1x16x128xf32, #tpu.memory_space<vmem>>, vector<1x16x128xf32>,
    %203 = arith.truncf %178 : vector<16x128xf32> to vector<16x128xbf16>
    %204 = arith.truncf %183 : vector<16x128xf32> to vector<16x128xbf16>
    %205 = arith.addf %178, %183 : vector<16x128xf32>
    %206 = arith.truncf %205 : vector<16x128xf32> to vector<16x128xbf16>
    %cst_148 = arith.constant dense<0.000000e+00> : vector<16x128xf32>
    %207 = tpu.matmul %3, %203, %cst_148 {dimension_numbers = #tpu.dot_dimension_numbers<[1], [0], [0], [1], [0, 0, 1, 1], [], []>} : vector<16x16xbf16>, vector<16x128xbf16>, vector<16x128xf32> -> vector<16x128xf32>
    %cst_149 = arith.constant dense<0.000000e+00> : vector<16x128xf32>
    %208 = tpu.matmul %4, %204, %cst_149 {dimension_numbers = #tpu.dot_dimension_numbers<[1], [0], [0], [1], [0, 0, 1, 1], [], []>} : vector<16x16xbf16>, vector<16x128xbf16>, vector<16x128xf32> -> vector<16x128xf32>
    %cst_150 = arith.constant dense<0.000000e+00> : vector<16x128xf32>
    %209 = tpu.matmul %5, %206, %cst_150 {dimension_numbers = #tpu.dot_dimension_numbers<[1], [0], [0], [1], [0, 0, 1, 1], [], []>} : vector<16x16xbf16>, vector<16x128xbf16>, vector<16x128xf32> -> vector<16x128xf32>
    %210 = arith.subf %207, %208 : vector<16x128xf32>
    %211 = arith.subf %209, %207 : vector<16x128xf32>
    %212 = arith.subf %211, %208 : vector<16x128xf32>
    %213 = arith.truncf %210 : vector<16x128xf32> to vector<16x128xbf16>
    %214 = arith.truncf %212 : vector<16x128xf32> to vector<16x128xbf16>
    %215 = arith.addf %210, %212 : vector<16x128xf32>
    %216 = arith.truncf %215 : vector<16x128xf32> to vector<16x128xbf16>
    %cst_151 = arith.constant dense<0.000000e+00> : vector<16x128xf32>
    %217 = tpu.matmul %213, %6, %cst_151 {dimension_numbers = #tpu.dot_dimension_numbers<[1], [0], [0], [1], [0, 0, 1, 1], [], []>} : vector<16x128xbf16>, vector<128x128xbf16>, vector<16x128xf32> -> vector<16x128xf32>
    %cst_152 = arith.constant dense<0.000000e+00> : vector<16x128xf32>
    %218 = tpu.matmul %214, %7, %cst_152 {dimension_numbers = #tpu.dot_dimension_numbers<[1], [0], [0], [1], [0, 0, 1, 1], [], []>} : vector<16x128xbf16>, vector<128x128xbf16>, vector<16x128xf32> -> vector<16x128xf32>
    %cst_153 = arith.constant dense<0.000000e+00> : vector<16x128xf32>
    %219 = tpu.matmul %216, %8, %cst_153 {dimension_numbers = #tpu.dot_dimension_numbers<[1], [0], [0], [1], [0, 0, 1, 1], [], []>} : vector<16x128xbf16>, vector<128x128xbf16>, vector<16x128xf32> -> vector<16x128xf32>
    %220 = arith.subf %217, %218 : vector<16x128xf32>
    %c3_154 = arith.constant 3 : index
    %c0_155 = arith.constant 0 : index
    %c0_156 = arith.constant 0 : index
    %221 = vector.load %arg13[%c3_154, %c0_155, %c0_156] : memref<4x16x128xf32, #tpu.memory_space<vmem>>, vector<1x16x128xf32>
    %222 = vector.shape_cast %221 : vector<1x16x128xf32> to vector<16x128xf32>
    %223 = vector.shape_cast %220 : vector<16x128xf32> to vector<1x16x128xf32>
    tpu.vector_store %arg13[%c3_154, %c0_155, %c0_156], %223 {strides = array<i32>} : memref<4x16x128xf32, #tpu.memory_space<vmem>>, vector<1x16x128xf32>,
    %224 = arith.subf %219, %217 : vector<16x128xf32>
    %225 = arith.subf %224, %218 : vector<16x128xf32>
    %c3_157 = arith.constant 3 : index
    %c0_158 = arith.constant 0 : index
    %c0_159 = arith.constant 0 : index
    %226 = vector.load %arg14[%c3_157, %c0_158, %c0_159] : memref<4x16x128xf32, #tpu.memory_space<vmem>>, vector<1x16x128xf32>
    %227 = vector.shape_cast %226 : vector<1x16x128xf32> to vector<16x128xf32>
    %228 = vector.shape_cast %225 : vector<16x128xf32> to vector<1x16x128xf32>
    tpu.vector_store %arg14[%c3_157, %c0_158, %c0_159], %228 {strides = array<i32>} : memref<4x16x128xf32, #tpu.memory_space<vmem>>, vector<1x16x128xf32>,
    return
  }
  func.func @transform_0(%arg0: i32, %arg1: i32) -> (i32, i32, i32) {
    %c2_i32 = arith.constant 2 : i32
    %0 = arith.muli %arg0, %c2_i32 : i32
    %1 = arith.addi %0, %arg1 : i32
    %c0_i32 = arith.constant 0 : i32
    %c0_i32_0 = arith.constant 0 : i32
    %c0_i32_1 = arith.constant 0 : i32
    return %1, %c0_i32, %c0_i32_0 : i32, i32, i32
  }
  func.func @transform_1(%arg0: i32, %arg1: i32) -> (i32, i32, i32) {
    %c2_i32 = arith.constant 2 : i32
    %0 = arith.muli %arg0, %c2_i32 : i32
    %1 = arith.addi %0, %arg1 : i32
    %c0_i32 = arith.constant 0 : i32
    %c0_i32_0 = arith.constant 0 : i32
    %c0_i32_1 = arith.constant 0 : i32
    return %1, %c0_i32, %c0_i32_0 : i32, i32, i32
  }
  func.func @transform_2(%arg0: i32, %arg1: i32) -> (i32, i32, i32) {
    %c2_i32 = arith.constant 2 : i32
    %0 = arith.muli %arg0, %c2_i32 : i32
    %1 = arith.addi %0, %arg1 : i32
    %c0_i32 = arith.constant 0 : i32
    %c0_i32_0 = arith.constant 0 : i32
    %c0_i32_1 = arith.constant 0 : i32
    return %1, %c0_i32, %c0_i32_0 : i32, i32, i32
  }
  func.func @transform_3(%arg0: i32, %arg1: i32) -> (i32, i32) {
    %c0_i32 = arith.constant 0 : i32
    %c0_i32_0 = arith.constant 0 : i32
    %c0_i32_1 = arith.constant 0 : i32
    return %c0_i32, %c0_i32_0 : i32, i32
  }
  func.func @transform_4(%arg0: i32, %arg1: i32) -> (i32, i32) {
    %c0_i32 = arith.constant 0 : i32
    %c0_i32_0 = arith.constant 0 : i32
    %c0_i32_1 = arith.constant 0 : i32
    return %c0_i32, %c0_i32_0 : i32, i32
  }
  func.func @transform_5(%arg0: i32, %arg1: i32) -> (i32, i32) {
    %c0_i32 = arith.constant 0 : i32
    %c0_i32_0 = arith.constant 0 : i32
    %c0_i32_1 = arith.constant 0 : i32
    return %c0_i32, %c0_i32_0 : i32, i32
  }
  func.func @transform_6(%arg0: i32, %arg1: i32) -> (i32, i32) {
    %c0_i32 = arith.constant 0 : i32
    %c0_i32_0 = arith.constant 0 : i32
    %c0_i32_1 = arith.constant 0 : i32
    return %c0_i32, %c0_i32_0 : i32, i32
  }
  func.func @transform_7(%arg0: i32, %arg1: i32) -> (i32, i32) {
    %c0_i32 = arith.constant 0 : i32
    %c0_i32_0 = arith.constant 0 : i32
    %c0_i32_1 = arith.constant 0 : i32
    return %c0_i32, %c0_i32_0 : i32, i32
  }
  func.func @transform_8(%arg0: i32, %arg1: i32) -> (i32, i32) {
    %c0_i32 = arith.constant 0 : i32
    %c0_i32_0 = arith.constant 0 : i32
    %c0_i32_1 = arith.constant 0 : i32
    return %c0_i32, %c0_i32_0 : i32, i32
  }
  func.func @transform_9(%arg0: i32, %arg1: i32) -> (i32, i32, i32) {
    %c2_i32 = arith.constant 2 : i32
    %0 = arith.muli %arg0, %c2_i32 : i32
    %1 = arith.addi %0, %arg1 : i32
    %c0_i32 = arith.constant 0 : i32
    %c0_i32_0 = arith.constant 0 : i32
    %c0_i32_1 = arith.constant 0 : i32
    return %1, %c0_i32, %c0_i32_0 : i32, i32, i32
  }
  func.func @transform_10(%arg0: i32, %arg1: i32) -> (i32, i32, i32) {
    %c2_i32 = arith.constant 2 : i32
    %0 = arith.muli %arg0, %c2_i32 : i32
    %1 = arith.addi %0, %arg1 : i32
    %c0_i32 = arith.constant 0 : i32
    %c0_i32_0 = arith.constant 0 : i32
    %c0_i32_1 = arith.constant 0 : i32
    return %1, %c0_i32, %c0_i32_0 : i32, i32, i32
  }
  func.func @transform_11(%arg0: i32, %arg1: i32) -> (i32, i32, i32) {
    %c2_i32 = arith.constant 2 : i32
    %0 = arith.muli %arg0, %c2_i32 : i32
    %1 = arith.addi %0, %arg1 : i32
    %c0_i32 = arith.constant 0 : i32
    %c0_i32_0 = arith.constant 0 : i32
    %c0_i32_1 = arith.constant 0 : i32
    return %1, %c0_i32, %c0_i32_0 : i32, i32, i32
  }
  func.func @transform_12(%arg0: i32, %arg1: i32) -> (i32, i32, i32) {
    %c2_i32 = arith.constant 2 : i32
    %0 = arith.muli %arg0, %c2_i32 : i32
    %1 = arith.addi %0, %arg1 : i32
    %c0_i32 = arith.constant 0 : i32
    %c0_i32_0 = arith.constant 0 : i32
    %c0_i32_1 = arith.constant 0 : i32
    return %1, %c0_i32, %c0_i32_0 : i32, i32, i32
  }
  func.func @transform_13(%arg0: i32, %arg1: i32) -> (i32, i32, i32) {
    %c2_i32 = arith.constant 2 : i32
    %0 = arith.muli %arg0, %c2_i32 : i32
    %1 = arith.addi %0, %arg1 : i32
    %c0_i32 = arith.constant 0 : i32
    %c0_i32_0 = arith.constant 0 : i32
    %c0_i32_1 = arith.constant 0 : i32
    return %1, %c0_i32, %c0_i32_0 : i32, i32, i32
  }
  func.func @transform_14(%arg0: i32, %arg1: i32) -> (i32, i32, i32) {
    %c0_i32 = arith.constant 0 : i32
    %c0_i32_0 = arith.constant 0 : i32
    %c0_i32_1 = arith.constant 0 : i32
    return %arg0, %c0_i32, %c0_i32_0 : i32, i32, i32
  }
}

</mosaic_0001>

<bundles_post_ra>
// kernel: tpu_custom_call.1
= control target key start
LH: loop header
LB: loop body
LE: loop exit
PB: predicated region body
PF: predicated region fallthrough
CT: control target
= control target key end

     0   :  { %s4066_s0 = inlined_call_operand.hbm [shape: f32[16,16,128], index: 0, kind: input, shape index: {}]   ;;  %s4067_s1 = inlined_call_operand.hbm [shape: f32[8,16,128], index: 1, kind: input, shape index: {}]   ;;  %s4068_s2 = inlined_call_operand.hbm [shape: f32[8,16,128], index: 2, kind: input, shape index: {}]   ;;  %s4069_s3 = inlined_call_operand.hbm [shape: bf16[16,16], index: 3, kind: input, shape index: {}]   ;;  %s4070_s4 = inlined_call_operand.hbm [shape: bf16[16,16], index: 4, kind: input, shape index: {}]   ;;  %s4071_s5 = inlined_call_operand.hbm [shape: bf16[16,16], index: 5, kind: input, shape index: {}]   ;;  %s4072_s6 = inlined_call_operand.hbm [shape: bf16[128,128], index: 6, kind: input, shape index: {}]   ;;  %s4073_s7 = inlined_call_operand.hbm [shape: bf16[128,128], index: 7, kind: input, shape index: {}]   ;;  %s4074_s8 = inlined_call_operand.hbm [shape: bf16[128,128], index: 8, kind: input, shape index: {}]   ;;  %s4075_s9 = inlined_call_operand.hbm [shape: f32[8,16,128], index: 9, kind: output, shape index: {0}]   ;;  %s4076_s10 = inlined_call_operand.hbm [shape: f32[8,16,128], index: 10, kind: output, shape index: {1}]   ;;  %s4077_s11 = inlined_call_operand.hbm [shape: f32[8,16,128], index: 11, kind: output, shape index: {2}]   ;;  %s4078_s12 = inlined_call_operand.hbm [shape: f32[8,16,128], index: 12, kind: output, shape index: {3}]   ;;  %s4079_s13 = inlined_call_operand.hbm [shape: f32[8,16,128], index: 13, kind: output, shape index: {4}]   ;;  %s4080_s14 = inlined_call_operand.hbm [shape: f32[1,16,128], index: 14, kind: output, shape index: {5}]  }
   0x1   :  { %4102 = sst [smem:[#allocation43_spill]] %s4066_s0 }
   0x2   :  { %4103 = sst [smem:[#allocation44_spill]] %s4067_s1 }
   0x3   :  { %4104 = sst [smem:[#allocation45_spill]] %s4068_s2 }
   0x4   :  { %4105 = sst [smem:[#allocation46_spill]] %s4069_s3 }
   0x5   :  { %4106 = sst [smem:[#allocation47_spill]] %s4070_s4 }
   0x6   :  { %4107 = sst [smem:[#allocation48_spill]] %s4071_s5 }
   0x7   :  { %4108 = sst [smem:[#allocation49_spill]] %s4073_s7 }
   0x8   :  { %4109 = sst [smem:[#allocation50_spill]] %s4075_s9 }
   0x9   :  { %4110 = sst [smem:[#allocation51_spill]] %s4076_s10 }
   0xa   :  { %4111 = sst [smem:[#allocation52_spill]] %s4077_s11 }
   0xb   :  { %4112 = sst [smem:[#allocation53_spill]] %s4078_s12 }
   0xc   :  { %4113 = sst [smem:[#allocation54_spill]] %s4079_s13 }
   0xd   :  { %4114 = sst [smem:[#allocation55_spill]] %s4080_s14 }
   0xe   :  { %20 = vsyncpa [#allocation3], 0 }
   0xf   :  { %22 = vsyncpa [#allocation3 + $0x1], 0 }
  0x10   :  { %23 = vsyncpa [#allocation6], 0 }
  0x11   :  { %25 = vsyncpa [#allocation6 + $0x1], 0 }
  0x12   :  { %26 = vsyncpa [#allocation9], 0 }
  0x13   :  { %27 = vsyncpa [#allocation12], 0 }
  0x14   :  { %28 = vsyncpa [#allocation15], 0 }
  0x15   :  { %29 = vsyncpa [#allocation4], 0 }
  0x16   :  { %31 = vsyncpa [#allocation4 + $0x1], 0 }
  0x17   :  { %32 = vsyncpa [#allocation19], 0 }
  0x18   :  { %34 = vsyncpa [#allocation19 + $0x1], 0 }
  0x19   :  { %35 = vsyncpa [#allocation22], 0 }
  0x1a   :  { %37 = vsyncpa [#allocation22 + $0x1], 0 }
  0x1b   :  { %38 = vsyncpa [#allocation25], 0  ;;  %s3245_s29 = smov 0   ;;  %s3247_s30 = smov 0  }
  0x1c   :  { %s3249_s15 = smov 0   ;;  %s3251_s16 = smov 0  }
  0x1d   :  { %s3253_s17 = smov 0   ;;  %s3255_s18 = smov 0  }
  0x1e LB: > { %4115 = sst [smem:[#allocation35_spill]] %s3134_s29  ;;  %s3276_s19 = sadd.s32 4294967295, %s3154_s18   ;;  %s3154_s18 = sphi %s3255_s18, %s44_s18   ;;  %s3150_s17 = sphi %s3253_s17, %s4162_s17   ;;  %s3146_s16 = sphi %s3251_s16, %s4161_s16   ;;  %s3142_s15 = sphi %s3249_s15, %s4157_s15   ;;  %s3138_s30 = sphi %s3247_s30, %s4160_s30   ;;  %s3134_s29 = sphi %s3245_s29, %s4159_s29  }
  0x1f   : > { %4116 = sst [smem:[#allocation36_spill]] %s3142_s15  ;;  %p2172_p0 = scmp.ge.s32.totalorder %s3154_s18, 1 }
  0x20   : > { %4117 = sst [smem:[#allocation37_spill]] %s3146_s16  ;;  %p81_p1 = scmp.eq.s32.totalorder %s3276_s19, 0 }
  0x21   : > { %4118 = sst [smem:[#allocation38_spill]] %s3154_s18  ;;  %p453_p2 = scmp.lt.s32.totalorder %s3154_s18, 3 }
  0x22   : > { %s4119_s3 = sld [smem:[#allocation46_spill]]  ;;  %s3156_s24 = smov [#allocation8]  }
  0x23   : > { %p3284_p3 = pnand %p2172_p0, %p453_p2  ;;  %s466_s25 = sshll.u32 %s3156_s24, 4  ;;  %s467_s25 = int_to_ptr.vmem [resolvable:$true] %s466_s25 }
  0x24   : > { %s4122_s5 = sld [smem:[#allocation48_spill]]  ;;  %s4082_s21 = smov 64  }
  0x25   : > { %p2495_p4 = pneg %p3284_p3  ;;  %s4084_s24 = smov 4  }
  0x26   : > { %s4123_s7 = sld [smem:[#allocation49_spill]]  ;;  %s53_s27 = sadd.s32 1, %s3150_s17 }
  0x27   : > { %p3292_p5 = pnand %p2495_p4, %p81_p1  ;;  %s67_s28 = sadd.s32 1, %s3142_s15 }
  0x28   : > { %s464_s22 = sshll.u32 %s4119_s3, 4  ;;  %s3159_s3 = smov [#allocation11]   ;;  %s465_s22 = int_to_ptr.hbm [resolvable:$true] %s464_s22 }
  0x29   : > { %2498 = dma.hbm_to_vmem [thread:$0]  (!%p3292_p5), %s465_s22, 128, %s467_s25, [#allocation9], %s4082_s21, %s4082_s21, %s4084_s24  }
  0x2a   : > { %s492_s20 = sshll.u32 %s4122_s5, 4  ;;  %s494_s13 = sshll.u32 %s3159_s3, 4  ;;  %s493_s20 = int_to_ptr.hbm [resolvable:$true] %s492_s20  ;;  %s495_s13 = int_to_ptr.vmem [resolvable:$true] %s494_s13 }
  0x2b   : > { %2504 = dma.hbm_to_vmem [thread:$0]  (!%p3292_p5), %s493_s20, 128, %s495_s13, [#allocation12], %s4082_s21, %s4082_s21, %s4084_s24  }
  0x2c   : > { %s520_s5 = sshll.u32 %s4123_s7, 4  ;;  %s3160_s22 = smov [#allocation14]   ;;  %s521_s5 = int_to_ptr.hbm [resolvable:$true] %s520_s5 }
  0x2d   : > { %s522_s25 = sshll.u32 %s3160_s22, 4  ;;  %s4086_s3 = sadd.s32 4294967294, %s3154_s18   ;;  %s523_s25 = int_to_ptr.vmem [resolvable:$true] %s522_s25 }
  0x2e   : > { %2510 = dma.hbm_to_vmem [thread:$0]  (!%p3292_p5), %s521_s5, 1024, %s523_s25, [#allocation15], %s4082_s21, %s4082_s21, %s4084_s24  }
  0x2f   : > { %p54_p7 = scmp.ge.s32.totalorder %s53_s27, 2  ;;  %p74_p8 = scmp.ne.s32.totalorder %s3142_s15, %s3138_s30 }
  0x30   : > { %p75_p9 = scmp.eq.s32.totalorder %s3154_s18, 0  ;;  %p80_p10 = scmp.ne.s32.totalorder %s3138_s30, %s3134_s29 }
  0x31   : > { %s4164_s27 = smov (%p54_p7, %s53_s27), 0  ;;  %p294_p13 = scmp.eq.s32.totalorder %s3276_s19, 1 }
  0x32   : > { %4124 = sst [smem:[#allocation39_spill]] %s4164_s27  ;;  %p76_p11 = por %p75_p9, %p74_p8 }
  0x33   : > { %p3330_p12 = por %p81_p1, %p80_p10  ;;  %s64_s5 = ssub.s32 %s3150_s17, %s4164_s27 }
  0x34   : > { %p65_p0 = scmp.eq.s32.totalorder %s64_s5, 0  ;;  %p300_p2 = scmp.eq.s32.totalorder %s4086_s3, 1 }
  0x35   : > { %p3341_p4 = por %p294_p13, %p74_p8  ;;  %p2546_p6 = scmp.lt.s32.totalorder %s3154_s18, 2 }
  0x36   : > { %s3347_s22 = scalar_select %p65_p0, %s3142_s15, %s67_s28  }
  0x37   : > { %s4126_s20 = scalar_select %p3341_p4, 1, 0 }
  0x38   : > { %4128 = sst [smem:[#allocation41_spill]] %s3347_s22  ;;  %p3349_p7 = por %p300_p2, %p80_p10 }
  0x39   : > { %4127 = sst [smem:[#allocation40_spill]] %s4126_s20  ;;  %s3354_s21 = sand.u32 1, %s3142_s15  }
  0x3a   : > { %s4129_s25 = scalar_select %p3349_p7, 1, 0 }
  0x3b   : > { %p3356_p9 = pnand %p2546_p6, %p76_p11  ;;  %s575_s5 = sand.u32 1, %s3154_s18  }
  0x3c   : > { %4130 = sst [smem:[#allocation42_spill]] %s4129_s25  ;;  %s2184_s3 = sshll.u32 %s3354_s21, 6 }
  0x3d   : > { %s2411_s7 = sshll.u32 %s3150_s17, 6  ;;  %s4132_s1 = sld [smem:[#allocation44_spill]] }
  0x3e   : > { %s579_s11 = scalar_lea.vmem [#allocation5], %s2184_s3  ;;  %s3366_s15 = scalar_lea.sflag [#allocation6], %s575_s5 }
  0x3f   : > { %s590_s12 = sshll.u32 %s579_s11, 4  ;;  %s4099_s25 = smov 128   ;;  %s591_s12 = int_to_ptr.vmem [resolvable:$true] %s590_s12 }
  0x40   : > { %s3162_s14 = smov 8   ;;  %s4133_s2 = sld [smem:[#allocation45_spill]] }
  0x41   : > { %s604_s11 = scalar_lea.vmem [#allocation7], %s2184_s3  ;;  %s4134_s4 = sld [smem:[#allocation47_spill]] }
  0x42   : > { %s3163_s20 = smov [#allocation10]   ;;  %s4135_s18 = smov 4  }
  0x43   : > { %s587_s28 = scalar_lea.hbm %s4132_s1, %s2411_s7  ;;  %s480_s16 = sshll.u32 %s3163_s20, 4  ;;  %s481_s16 = int_to_ptr.vmem [resolvable:$true] %s480_s16 }
  0x44   : > { %s588_s22 = sshll.u32 %s587_s28, 4  ;;  %s615_s28 = sshll.u32 %s604_s11, 4  ;;  %s589_s22 = int_to_ptr.hbm [resolvable:$true] %s588_s22  ;;  %s616_s28 = int_to_ptr.vmem [resolvable:$true] %s615_s28 }
  0x45   : > { %2520 = dma.hbm_to_vmem [thread:$0]  (!%p3356_p9), %s589_s22, 1024, %s591_s12, %s3366_s15, %s4099_s25, %s4099_s25, %s3162_s14  }
  0x46   : > { %s612_s29 = scalar_lea.hbm %s4133_s2, %s2411_s7  ;;  %s506_s7 = sshll.u32 %s4072_s6, 4  ;;  %s507_s7 = int_to_ptr.hbm [resolvable:$true] %s506_s7 }
  0x47   : > { %s613_s27 = sshll.u32 %s612_s29, 4  ;;  %s478_s10 = sshll.u32 %s4134_s4, 4  ;;  %s3377_s27 = int_to_ptr.hbm [resolvable:$true] %s613_s27  ;;  %s479_s10 = int_to_ptr.hbm [resolvable:$true] %s478_s10 }
  0x48   : > { %s4136_s22 = smov 64   ;;  %s3164_s3 = smov [#allocation13]  }
  0x49   : > { %2501 = dma.hbm_to_vmem [thread:$0]  (!%p3292_p5), %s479_s10, 128, %s481_s16, [#allocation9], %s4136_s22, %s4136_s22, %s4135_s18  }
  0x4a   : > { %s508_s1 = sshll.u32 %s3164_s3, 4  ;;  %s534_s5 = sshll.u32 %s4074_s8, 4  ;;  %s509_s1 = int_to_ptr.vmem [resolvable:$true] %s508_s1  ;;  %s535_s5 = int_to_ptr.hbm [resolvable:$true] %s534_s5 }
  0x4b   : > { %2507 = dma.hbm_to_vmem [thread:$0]  (!%p3292_p5), %s507_s7, 1024, %s509_s1, [#allocation12], %s4136_s22, %s4136_s22, %s4135_s18  }
  0x4c   : > { %s3165_s10 = smov [#allocation16]   ;;  %s2180_s20 = sshll.u32 %s3354_s21, 7 }
  0x4d   : > { %s536_s16 = sshll.u32 %s3165_s10, 4  ;;  %s2409_s12 = sshll.u32 %s3150_s17, 7  ;;  %s537_s16 = int_to_ptr.vmem [resolvable:$true] %s536_s16 }
  0x4e   : > { %2513 = dma.hbm_to_vmem [thread:$0]  (!%p3292_p5), %s535_s5, 1024, %s537_s16, [#allocation15], %s4136_s22, %s4136_s22, %s4135_s18  }
  0x4f   : > { %s554_s9 = scalar_lea.vmem [#allocation2], %s2180_s20  ;;  %s4137_s0 = sld [smem:[#allocation43_spill]] }
  0x50   : > { %s565_s3 = sshll.u32 %s554_s9, 4  ;;  %s551_s1 = scalar_lea.sflag [#allocation3], %s3354_s21  ;;  %s566_s3 = int_to_ptr.vmem [resolvable:$true] %s565_s3 }
  0x51   : > { %s4138_s10 = smov 128   ;;  %s3424_s26 = sand.u32 (!%p3284_p3), 1, %s3138_s30  }
  0x52   : > { %2523 = dma.hbm_to_vmem [thread:$0]  (!%p3356_p9), %s3377_s27, 1024, %s616_s28, %s3366_s15, %s4138_s10, %s4138_s10, %s3162_s14  }
  0x53   : > { %627 = sbr.rel (%p3284_p3) target bundleno = 786 (0x312), region = 56  ;;  %s2193_s21 = sshll.u32 (!%p3284_p3), %s3424_s26, 7 }
  0x54   : > { %s3428_s18 = scalar_lea.vmem (!%p3284_p3), [#allocation2], %s2193_s21 }
  0x55   : > { %s562_s25 = scalar_lea.hbm %s4137_s0, %s2409_s12 }
  0x56   : > { %s563_s7 = sshll.u32 %s562_s25, 4  ;;  %s630_s25 = scalar_lea.sflag (!%p3284_p3), [#allocation3], %s3424_s26  ;;  %s564_s7 = int_to_ptr.hbm [resolvable:$true] %s563_s7 }
  0x57   : > { %2517 = dma.hbm_to_vmem [thread:$0]  (!%p3356_p9), %s564_s7, 2048, %s566_s3, %s551_s1, %s4138_s10, %s4138_s10, %s3162_s14  }
  0x58   : > { %3097 = dma.done.wait (%p3330_p12), %s630_s25, 2048  }
  0x59   : > { %3099 = vsyncadd (%p3330_p12), %s630_s25, 4294965248  ;;  %s3435_s14 = sand.u32 1, %s3276_s19   ;;  %s2194_s15 = sshll.u32 %s3424_s26, 6 }
  0x5a   : > { %s640_s23 = scalar_lea.sflag [#allocation6], %s3435_s14  ;;  %s3439_s24 = scalar_lea.vmem [#allocation5], %s2194_s15 }
  0x5b   : > { %3101 = dma.done.wait (%p3330_p12), %s640_s23, 2048  }
  0x5c   : > { %3103 = vsyncadd (%p3330_p12), %s640_s23, 4294965248  ;;  %s3445_s27 = scalar_lea.vmem [#allocation7], %s2194_s15 }
  0x5d   : > { %3105 = dma.done.wait (%p81_p1), [#allocation9], 256  }
  0x5e   : > { %3107 = vsyncadd (%p81_p1), [#allocation9], 4294967040 }
  0x5f   : > { %3109 = dma.done.wait (%p81_p1), [#allocation12], 1152  }
  0x60   : > { %3111 = vsyncadd (%p81_p1), [#allocation12], 4294966144 }
  0x61   : > { %3113 = dma.done.wait (%p81_p1), [#allocation15], 2048  }
  0x62   : > { %3115 = vsyncadd (%p81_p1), [#allocation15], 4294965248  ;;  %s3459_s13 = scalar_lea.vmem [#allocation17], %s2194_s15  ;;  %s3461_s28 = scalar_lea.vmem [#allocation18], %s2194_s15 }
  0x63   : > { %s3463_s22 = scalar_lea.vmem [#allocation20], %s2194_s15  ;;  %s3465_s5 = scalar_lea.vmem [#allocation21], %s2194_s15 }
  0x64   : > { %s3467_s16 = scalar_lea.vmem [#allocation23], %s2194_s15  ;;  %s4139_s20 = sld [smem:[#allocation37_spill]] }
  0x6a   : > { %p2207_p3 = scmp.ne.s32.totalorder %s4139_s20, 0 }
  0x6c   : > { %787 = sbr.rel (%p2207_p3) target bundleno = 116 (0x74), region = 96 }
  0x71   : > { %v3166_v0 = vmov 0.0  }
  0x72   : > { %788 = vst [vmem:[#allocation24] sm:$0xff] %v3166_v0 }
  0x73   : > { %789 = vst [vmem:[#allocation24 + $0x8] sm:$0xff] %v3166_v0 }
  0x74 PF: > { %v844_v1 = vld [vmem:[%s3428_s18] sm:$0xff]  ;;  %v845_v2 = vld [vmem:[%s3428_s18 + $0x8] sm:$0xff]  ;;  %v2208_v6 = vld [vmem:[%s3428_s18 + $0x10] sm:$0xff]  ;;  %vm909_vm0 = vcmask 130048   ;;  %s4140_s12 = sld [smem:[#allocation37_spill]]  ;;  %s1753_s10 = sshll.u32 %s3461_s28, 4  ;;  %s1754_s10 = int_to_ptr.vmem [resolvable:$true] %s1753_s10 }
  0x75   : > { %v846_v3 = vld [vmem:[%s3439_s24] sm:$0xff]  ;;  %v847_v4 = vld [vmem:[%s3439_s24 + $0x8] sm:$0xff]  ;;  %v2209_v7 = vld [vmem:[%s3428_s18 + $0x18] sm:$0xff]  ;;  %s4142_s7 = sld [smem:[#allocation51_spill]]  ;;  %s4101_s25 = scalar_lea.sflag [#allocation19], %s3435_s14 }
  0x76   : > { %v848_v5 = vadd.f32 %v846_v3, %v844_v1  ;;  %v849_v8 = vadd.f32 %v847_v4, %v845_v2  ;;  %v853_v9 = vld [vmem:[%s3445_s27] sm:$0xff]  ;;  %v854_v10 = vld [vmem:[%s3445_s27 + $0x8] sm:$0xff]  ;;  %v2323_v18 = vld [vmem:[%s3439_s24 + $0x10] sm:$0xff] }
  0x77   : > { %v855_v12 = vadd.f32 %v2208_v6, %v853_v9  ;;  %v856_v13 = vadd.f32 %v2209_v7, %v854_v10  ;;  %v2321_v14 = vld [vmem:[%s3428_s18 + $0x20] sm:$0xff]  ;;  %v2322_v17 = vld [vmem:[%s3428_s18 + $0x28] sm:$0xff]  ;;  %v2324_v19 = vld [vmem:[%s3439_s24 + $0x18] sm:$0xff] }
  0x78   : > { %857 = vst [vmem:[%s3459_s13] sm:$0xff] %v848_v5  ;;  %v861_v11 = vmul.f32 %v848_v5, %v848_v5  ;;  %v862_v15 = vmul.f32 %v849_v8, %v849_v8  ;;  %v899_v16 = vpack.c.bf16 %v849_v8, %v848_v5  ;;  %v3485_v24 = vld [vmem:[#allocation8] sm:$0xff]  ;;  %v3487_v25 = vld [vmem:[#allocation13 + $0x38] sm:$0xff]  ;;  %v3490_v27 = vld [vmem:[#allocation10] sm:$0xff]  ;;  %v3492_v28 = vadd.f32 %v2323_v18, %v2321_v14 }
  0x79   : > { %858 = vst [vmem:[%s3459_s13 + $0x8] sm:$0xff] %v849_v8  ;;  %v863_v20 = vmul.f32 %v855_v12, %v855_v12  ;;  %v864_v21 = vmul.f32 %v856_v13, %v856_v13  ;;  %v900_v22 = vpack.c.bf16 %v856_v13, %v855_v12  ;;  %v901_v23 = vadd.f32 %v855_v12, %v848_v5  ;;  %v3496_v30 = vld [vmem:[#allocation16 + $0x38] sm:$0xff]  ;;  %v3503_v33 = vld [vmem:[#allocation13 + $0x30] sm:$0xff]  ;;  %v2326_v38 = vld [vmem:[%s3428_s18 + $0x38] sm:$0xff] }
  0x7a   : > { %859 = vst [vmem:[%s3461_s28] sm:$0xff] %v855_v12  ;;  %920 = vmatpush.bf16.msra.mxu0 %v899_v16  ;;  %v902_v26 = vadd.f32 %v856_v13, %v849_v8  ;;  %v3494_v29 = vadd.f32 %v2324_v19, %v2322_v17  ;;  %1030 = vmatpush.bf16.msra.mxu3 %v3487_v25  ;;  %v3505_v34 = vld [vmem:[#allocation14 + $0x38] sm:$0xff]  ;;  %v2328_v40 = vld [vmem:[%s3445_s27 + $0x18] sm:$0xff]  ;;  %v3522_v42 = vld [vmem:[#allocation16 + $0x30] sm:$0xff]  ;;  %s3791_s3 = sshll.u32 %s4140_s12, 6 }
  0x7b   : > { %860 = vst [vmem:[%s3461_s28 + $0x8] sm:$0xff] %v856_v13  ;;  %v3498_v31 = vadd.f32 %v863_v20, %v861_v11  ;;  %v3500_v32 = vadd.f32 %v864_v21, %v862_v15  ;;  %942 = vmatpush.bf16.msra.mxu1 %v900_v22  ;;  %v2325_v35 = vld [vmem:[%s3428_s18 + $0x30] sm:$0xff]  ;;  %v3527_v43 = vld [vmem:[#allocation13 + $0x28] sm:$0xff]  ;;  %v3531_v45 = vadd.f32 %v2328_v40, %v2326_v38  ;;  %v3534_v46 = vld [vmem:[#allocation14 + $0x30] sm:$0xff]  ;;  %s1752_s1 = scalar_lea.hbm %s4142_s7, %s3791_s3 }
  0x7c   : > { %v903_v36 = vpack.c.bf16 %v902_v26, %v901_v23  ;;  %2329 = vst [vmem:[%s3459_s13 + $0x10] sm:$0xff] %v3492_v28  ;;  %v1239_v37 = vpack.c.bf16 %v3494_v29, %v3492_v28  ;;  %v2327_v39 = vld [vmem:[%s3445_s27 + $0x10] sm:$0xff]  ;;  %v3546_v48 = vld [vmem:[#allocation13 + $0x20] sm:$0xff]  ;;  %v3559_v50 = vld [vmem:[#allocation14 + $0x28] sm:$0xff]  ;;  %s1755_s21 = sshll.u32 %s1752_s1, 4  ;;  %s1756_s21 = int_to_ptr.hbm [resolvable:$true] %s1755_s21 }
  0x7d   : > { %2214 = vmatmul.msk.bf16.vlgmr.msra.gmra.mxu0 %vm909_vm0, %v3485_v24  ;;  %v3517_v41 = vld [vmem:[#allocation11] sm:$0xff]  ;;  %2330 = vst [vmem:[%s3459_s13 + $0x18] sm:$0xff] %v3494_v29  ;;  %v3529_v44 = vadd.f32 %v2327_v39, %v2325_v35  ;;  %v3562_v51 = vld [vmem:[#allocation13 + $0x10] sm:$0xff]  ;;  %v3564_v52 = vld [vmem:[#allocation16 + $0x28] sm:$0xff]  ;;  %v1242_v62 = vadd.f32 %v3531_v45, %v3494_v29 }
  0x7e   : > { %964 = vmatpush.bf16.msra.mxu2 %v903_v36  ;;  %2219 = vmatmul.msk.bf16.vlgmr.msra.gmra.mxu1 %vm909_vm0, %v3490_v27  ;;  %2332 = vst [vmem:[%s3461_s28 + $0x18] sm:$0xff] %v3531_v45  ;;  %v3550_v49 = vld [vmem:[#allocation13 + $0x18] sm:$0xff]  ;;  %v3566_v53 = vld [vmem:[#allocation14 + $0x20] sm:$0xff]  ;;  %v3570_v54 = vld [vmem:[#allocation13 + $0x8] sm:$0xff] }
  0x7f   : > { %1154 = vmatpush.bf16.msrb.mxu1 %v3496_v30  ;;  %1031 = vmatpush.bf16.msra.mxu3 %v3503_v33  ;;  %2331 = vst [vmem:[%s3461_s28 + $0x10] sm:$0xff] %v3529_v44  ;;  %v1240_v47 = vpack.c.bf16 %v3531_v45, %v3529_v44  ;;  %v3572_v55 = vld [vmem:[#allocation16 + $0x20] sm:$0xff]  ;;  %v3578_v56 = vld [vmem:[#allocation14 + $0x18] sm:$0xff]  ;;  %v3588_v59 = vld [vmem:[#allocation14 + $0x10] sm:$0xff]  ;;  %v1241_v61 = vadd.f32 %v3529_v44, %v3492_v28 }
  0x80   : > { %1092 = vmatpush.bf16.msrb.mxu0 %v3505_v34  ;;  %v3582_v57 = vld [vmem:[#allocation13] sm:$0xff]  ;;  %v3584_v58 = vld [vmem:[#allocation16 + $0x18] sm:$0xff]  ;;  %v3592_v60 = vld [vmem:[#allocation16 + $0x10] sm:$0xff] }
  0x81   : > { %2224 = vmatmul.msk.bf16.vlgmr.msra.gmra.mxu2 %vm909_vm0, %v3517_v41  ;;  %v3599_v63 = vld [vmem:[#allocation14 + $0x8] sm:$0xff]  ;;  %v1243_v0 = vpack.c.bf16 %v1242_v62, %v1241_v61  ;;  %v3606_v2 = vld [vmem:[#allocation14] sm:$0xff]  ;;  %v2343_v5 = vld [vmem:[%s3428_s18 + $0x48] sm:$0xff] }
  0x82   : > { %1251 = vmatpush.bf16.msrb.mxu2 %v1239_v37  ;;  %v3603_v1 = vld [vmem:[#allocation16 + $0x8] sm:$0xff]  ;;  %v3610_v3 = vld [vmem:[#allocation16] sm:$0xff]  ;;  %v2345_v7 = vld [vmem:[%s3439_s24 + $0x28] sm:$0xff] }
  0x83   : > { %1155 = vmatpush.bf16.msrb.mxu1 %v3522_v42  ;;  %1032 = vmatpush.bf16.msra.mxu3 %v3527_v43  ;;  %v2342_v4 = vld [vmem:[%s3428_s18 + $0x40] sm:$0xff]  ;;  %v3627_v10 = vadd.f32 %v2345_v7, %v2343_v5  ;;  %v2346_v19 = vld [vmem:[%s3428_s18 + $0x50] sm:$0xff]  ;;  %v2347_v20 = vld [vmem:[%s3428_s18 + $0x58] sm:$0xff] }
  0x84   : > { %1093 = vmatpush.bf16.msrb.mxu0 %v3534_v46  ;;  %v2344_v6 = vld [vmem:[%s3439_s24 + $0x20] sm:$0xff]  ;;  %v2349_v23 = vld [vmem:[%s3445_s27 + $0x28] sm:$0xff] }
  0x85   : > { %v3624_v8 = vadd.f32 %v2344_v6, %v2342_v4  ;;  %2351 = vst [vmem:[%s3459_s13 + $0x28] sm:$0xff] %v3627_v10  ;;  %v2348_v21 = vld [vmem:[%s3445_s27 + $0x20] sm:$0xff]  ;;  %v3653_v35 = vadd.f32 %v2349_v23, %v2347_v20 }
  0x86   : > { %1265 = vmatpush.bf16.msra.mxu2 %v1240_v47  ;;  %v3650_v26 = vadd.f32 %v2348_v21, %v2346_v19 }
  0x87   : > { %1033 = vmatpush.bf16.msra.mxu3 %v3546_v48  ;;  %1156 = vmatpush.bf16.msrb.mxu1 %v3564_v52  ;;  %2350 = vst [vmem:[%s3459_s13 + $0x20] sm:$0xff] %v3624_v8  ;;  %v1412_v17 = vpack.c.bf16 %v3627_v10, %v3624_v8 }
  0x88   : > { %1094 = vmatpush.bf16.msrb.mxu0 %v3559_v50  ;;  %2352 = vst [vmem:[%s3461_s28 + $0x20] sm:$0xff] %v3650_v26 }
  0x89   : > { %2353 = vst [vmem:[%s3461_s28 + $0x28] sm:$0xff] %v3653_v35 }
  0x8b   : > { %1034 = vmatpush.bf16.msra.mxu3 %v3550_v49  ;;  %1157 = vmatpush.bf16.msrb.mxu1 %v3572_v55 }
  0x8c   : > { %1095 = vmatpush.bf16.msrb.mxu0 %v3566_v53 }
  0x8f   : > { %1035 = vmatpush.bf16.msra.mxu3 %v3562_v51  ;;  %1158 = vmatpush.bf16.msrb.mxu1 %v3584_v58 }
  0x90   : > { %1096 = vmatpush.bf16.msrb.mxu0 %v3578_v56 }
  0x91   : > { %2335 = vmatmul.msk.bf16.vlgmr.msrb.gmra.mxu2 %vm909_vm0, %v3485_v24 }
  0x92   : > { %1325 = vmatpush.bf16.msrb.mxu2 %v3496_v30 }
  0x93   : > { %1036 = vmatpush.bf16.msra.mxu3 %v3570_v54  ;;  %1159 = vmatpush.bf16.msrb.mxu1 %v3592_v60 }
  0x94   : > { %1097 = vmatpush.bf16.msrb.mxu0 %v3588_v59 }
  0x96   : > { %1326 = vmatpush.bf16.msrb.mxu2 %v3522_v42 }
  0x97   : > { %1037 = vmatpush.bf16.msra.mxu3 %v3582_v57  ;;  %1160 = vmatpush.bf16.msrb.mxu1 %v3603_v1 }
  0x98   : > { %1098 = vmatpush.bf16.msrb.mxu0 %v3599_v63 }
  0x9a   : > { %1327 = vmatpush.bf16.msrb.mxu2 %v3564_v52 }
  0x9b   : > { %1279 = vmatpush.bf16.msrb.mxu3 %v1243_v0  ;;  %1161 = vmatpush.bf16.msrb.mxu1 %v3610_v3  ;;  %v1413_v0 = vpack.c.bf16 %v3653_v35, %v3650_v26 }
  0x9c   : > { %1099 = vmatpush.bf16.msrb.mxu0 %v3606_v2 }
  0x9e   : > { %1328 = vmatpush.bf16.msrb.mxu2 %v3572_v55 }
  0x9f   : > { %1311 = vmatpush.bf16.msra.mxu1 %v3505_v34 }
  0xa0   : > { %1297 = vmatpush.bf16.msra.mxu0 %v3487_v25 }
  0xa1   : > { %2336 = vmatmul.msk.bf16.vlgmr.msra.gmra.mxu2 %vm909_vm0, %v3490_v27 }
  0xa2   : > { %1329 = vmatpush.bf16.msrb.mxu2 %v3584_v58 }
  0xa3   : > { %1312 = vmatpush.bf16.msra.mxu1 %v3534_v46 }
  0xa4   : > { %1298 = vmatpush.bf16.msra.mxu0 %v3503_v33 }
  0xa6   : > { %1330 = vmatpush.bf16.msrb.mxu2 %v3592_v60 }
  0xa7   : > { %1313 = vmatpush.bf16.msra.mxu1 %v3559_v50 }
  0xa8   : > { %1299 = vmatpush.bf16.msra.mxu0 %v3527_v43 }
  0xaa   : > { %1331 = vmatpush.bf16.msrb.mxu2 %v3603_v1 }
  0xab   : > { %1314 = vmatpush.bf16.msra.mxu1 %v3566_v53 }
  0xac   : > { %1300 = vmatpush.bf16.msra.mxu0 %v3546_v48 }
  0xae   : > { %1332 = vmatpush.bf16.msrb.mxu2 %v3610_v3 }
  0xaf   : > { %1315 = vmatpush.bf16.msra.mxu1 %v3578_v56 }
  0xb0   : > { %1301 = vmatpush.bf16.msra.mxu0 %v3550_v49 }
  0xb2   : > { %1484 = vmatpush.bf16.msra.mxu2 %v3505_v34 }
  0xb3   : > { %1316 = vmatpush.bf16.msra.mxu1 %v3588_v59 }
  0xb4   : > { %1302 = vmatpush.bf16.msra.mxu0 %v3562_v51 }
  0xb6   : > { %1485 = vmatpush.bf16.msra.mxu2 %v3534_v46 }
  0xb7   : > { %1317 = vmatpush.bf16.msra.mxu1 %v3599_v63 }
  0xb8   : > { %1303 = vmatpush.bf16.msra.mxu0 %v3570_v54 }
  0xba   : > { %1486 = vmatpush.bf16.msra.mxu2 %v3559_v50 }
  0xbb   : > { %1318 = vmatpush.bf16.msra.mxu1 %v3606_v2 }
  0xbc   : > { %1304 = vmatpush.bf16.msra.mxu0 %v3582_v57 }
  0xbe   : > { %1487 = vmatpush.bf16.msra.mxu2 %v3566_v53 }
  0xc2   : > { %1488 = vmatpush.bf16.msra.mxu2 %v3578_v56 }
  0xc6   : > { %1489 = vmatpush.bf16.msra.mxu2 %v3588_v59 }
  0xca   : > { %1490 = vmatpush.bf16.msra.mxu2 %v3599_v63 }
  0xce   : > { %1491 = vmatpush.bf16.msra.mxu2 %v3606_v2 }
  0xfa   : > { %v922_v9 = vpop.f32.mrf.mxu0 }
  0xfb   : > { %v944_v11 = vpop.f32.mrf.mxu1 }
  0xfc   : > { %v971_v14 = vsub.f32 %v922_v9, %v944_v11 }
 0x102   : > { %v924_v12 = vpop.f32.mrf.mxu0 }
 0x103   : > { %v946_v13 = vpop.f32.mrf.mxu1 }
 0x104   : > { %v972_v15 = vsub.f32 %v924_v12, %v946_v13  ;;  %v966_v16 = vpop.f32.mrf.mxu2 }
 0x105   : > { %v973_v22 = vsub.f32 %v966_v16, %v922_v9 }
 0x106   : > { %v977_v18 = vpack.c.bf16 %v972_v15, %v971_v14 }
 0x107   : > { %v975_v37 = vsub.f32 %v973_v22, %v944_v11 }
 0x108   : > { %1038 = vmatmul.bf16.vlgmr.msra.gmra.mxu3 %v977_v18 }
 0x109   : > { %1424 = vmatpush.bf16.msra.mxu3 %v1412_v17  ;;  %v979_v40 = vadd.f32 %v975_v37, %v971_v14  ;;  %v2364_v14 = vld [vmem:[%s3428_s18 + $0x68] sm:$0xff] }
 0x10c   : > { %v968_v36 = vpop.f32.mrf.mxu2 }
 0x10d   : > { %v974_v38 = vsub.f32 %v968_v36, %v924_v12 }
 0x10f   : > { %v976_v39 = vsub.f32 %v974_v38, %v946_v13 }
 0x111   : > { %v980_v47 = vadd.f32 %v976_v39, %v972_v15  ;;  %v978_v61 = vpack.c.bf16 %v976_v39, %v975_v37  ;;  %v2366_v15 = vld [vmem:[%s3439_s24 + $0x38] sm:$0xff]  ;;  %v2367_v39 = vld [vmem:[%s3428_s18 + $0x70] sm:$0xff] }
 0x113   : > { %1100 = vmatmul.bf16.vlgmr.msrb.gmra.mxu0 %v978_v61  ;;  %v981_v62 = vpack.c.bf16 %v980_v47, %v979_v40  ;;  %v2368_v40 = vld [vmem:[%s3428_s18 + $0x78] sm:$0xff]  ;;  %v2369_v47 = vld [vmem:[%s3445_s27 + $0x30] sm:$0xff] }
 0x114   : > { %v3668_v4 = vpop.f32.mrf.mxu2  ;;  %v2370_v61 = vld [vmem:[%s3445_s27 + $0x38] sm:$0xff]  ;;  %s2924_s27 = scalar_lea.hbm %s4142_s7, 128 }
 0x115   : > { %1162 = vmatmul.bf16.vlgmr.msrb.gmra.mxu1 %v981_v62  ;;  %v1538_v62 = vadd.f32 %v2369_v47, %v2367_v39 }
 0x117   : > { %2373 = vst [vmem:[%s3461_s28 + $0x30] sm:$0xff] %v1538_v62 }
 0x118   : > { %2337 = vmatmul.msk.bf16.vlgmr.msrb.gmra.mxu3 %vm909_vm0, %v3517_v41 }
 0x119   : > { %1438 = vmatpush.bf16.msrb.mxu3 %v1413_v0 }
 0x11c   : > { %v3670_v5 = vpop.f32.mrf.mxu2 }
 0x124   : > { %v3674_v6 = vpop.f32.mrf.mxu2 }
 0x125   : > { %v3680_v7 = vsub.f32 %v3668_v4, %v3674_v6 }
 0x128   : > { %2356 = vmatmul.msk.bf16.vlgmr.msra.gmra.mxu3 %vm909_vm0, %v3485_v24 }
 0x129   : > { %1498 = vmatpush.bf16.msra.mxu3 %v3496_v30 }
 0x12c   : > { %v3682_v9 = vpop.f32.mrf.mxu2 }
 0x12d   : > { %1499 = vmatpush.bf16.msra.mxu3 %v3522_v42  ;;  %v3686_v11 = vsub.f32 %v3670_v5, %v3682_v9 }
 0x12f   : > { %v1292_v12 = vpack.c.bf16 %v3686_v11, %v3680_v7 }
 0x131   : > { %1500 = vmatpush.bf16.msra.mxu3 %v3564_v52  ;;  %1305 = vmatmul.bf16.vlgmr.msra.gmra.mxu0 %v1292_v12 }
 0x135   : > { %1501 = vmatpush.bf16.msra.mxu3 %v3572_v55 }
 0x138   : > { %2357 = vmatmul.msk.bf16.vlgmr.msrb.gmra.mxu3 %vm909_vm0, %v3490_v27 }
 0x139   : > { %1502 = vmatpush.bf16.msra.mxu3 %v3584_v58 }
 0x13d   : > { %1503 = vmatpush.bf16.msra.mxu3 %v3592_v60 }
 0x141   : > { %1504 = vmatpush.bf16.msra.mxu3 %v3603_v1 }
 0x145   : > { %1505 = vmatpush.bf16.msra.mxu3 %v3610_v3 }
 0x149   : > { %1657 = vmatpush.bf16.msrb.mxu3 %v3505_v34  ;;  %v1414_v34 = vadd.f32 %v3650_v26, %v3624_v8 }
 0x14d   : > { %1658 = vmatpush.bf16.msrb.mxu3 %v3534_v46  ;;  %v1415_v46 = vadd.f32 %v3653_v35, %v3627_v10 }
 0x14f   : > { %v1416_v13 = vpack.c.bf16 %v1415_v46, %v1414_v34  ;;  %v1539_v34 = vadd.f32 %v2370_v61, %v2368_v40  ;;  %v1548_v46 = vmul.f32 %v1538_v62, %v1538_v62 }
 0x151   : > { %1659 = vmatpush.bf16.msrb.mxu3 %v3559_v50  ;;  %1452 = vmatpush.bf16.msrb.mxu1 %v1416_v13  ;;  %v1549_v13 = vmul.f32 %v1539_v34, %v1539_v34  ;;  %2374 = vst [vmem:[%s3461_s28 + $0x38] sm:$0xff] %v1539_v34 }
 0x155   : > { %1660 = vmatpush.bf16.msrb.mxu3 %v3566_v53  ;;  %v2363_v53 = vld [vmem:[%s3428_s18 + $0x60] sm:$0xff]  ;;  %s2918_s18 = sshra.s32 %s1756_s21, 4  ;;  %s2919_s18 = int_to_ptr.hbm [resolvable:$true] %s2918_s18 }
 0x156   : > { %s2920_s15 = scalar_lea.hbm %s2919_s18, 64  ;;  %p2925_p8 = scmp.lt.s32.totalorder %s2919_s18, %s4142_s7 }
 0x157   : > { %p2921_p1 = scmp.ne.s32.totalorder %s2919_s18, %s2920_s15  ;;  %p2926_p10 = scmp.lt.s32.totalorder %s2924_s27, %s2920_s15 }
 0x159   : > { %1661 = vmatpush.bf16.msrb.mxu3 %v3578_v56  ;;  %v2365_v56 = vld [vmem:[%s3439_s24 + $0x30] sm:$0xff]  ;;  %p2922_p5 = pnand %p2921_p1, %p3341_p4  ;;  %p2927_p11 = por %p2926_p10, %p2925_p8 }
 0x15b   : > { %p2923_p6 = pneg %p2922_p5 }
 0x15d   : > { %1662 = vmatpush.bf16.msrb.mxu3 %v3588_v59  ;;  %v3714_v59 = vadd.f32 %v2365_v56, %v2363_v53  ;;  %p2928_p12 = pnand %p2927_p11, %p2923_p6 }
 0x15f   : > { %2371 = vst [vmem:[%s3459_s13 + $0x30] sm:$0xff] %v3714_v59 }
 0x161   : > { %1663 = vmatpush.bf16.msrb.mxu3 %v3599_v63  ;;  %v3716_v63 = vadd.f32 %v2366_v15, %v2364_v14 }
 0x163   : > { %2372 = vst [vmem:[%s3459_s13 + $0x38] sm:$0xff] %v3716_v63  ;;  %v1547_v12 = vmul.f32 %v3716_v63, %v3716_v63 }
 0x165   : > { %1664 = vmatpush.bf16.msrb.mxu3 %v3606_v2  ;;  %v1585_v2 = vpack.c.bf16 %v3716_v63, %v3714_v59  ;;  %v3743_v56 = vadd.f32 %v1549_v13, %v1547_v12 }
 0x167   : > { %1597 = vmatpush.bf16.msrb.mxu0 %v1585_v2 }
 0x16a   : > { %2377 = vmatmul.msk.bf16.vlgmr.msrb.gmra.mxu0 %vm909_vm0, %v3485_v24  ;;  %v1546_v24 = vmul.f32 %v3714_v59, %v3714_v59 }
 0x16c   : > { %v3741_v14 = vadd.f32 %v1548_v46, %v1546_v24 }
 0x18b   : > { %v1039_v50 = vpop.f32.mrf.mxu3 }
 0x190   : > { %v1101_v16 = vpop.f32.mrf.mxu0 }
 0x191   : > { %v1168_v17 = vsub.f32 %v1039_v50, %v1101_v16 }
 0x192   : > { %v1163_v18 = vpop.f32.mrf.mxu1 }
 0x193   : > { %1170 = vst [vmem:[%s3463_s22] sm:$0xff] %v1168_v17  ;;  %v1172_v19 = vsub.f32 %v1163_v18, %v1039_v50  ;;  %v1041_v20 = vpop.f32.mrf.mxu3  ;;  %v1586_v50 = vpack.c.bf16 %v1539_v34, %v1538_v62 }
 0x195   : > { %v1174_v21 = vsub.f32 %v1172_v19, %v1101_v16  ;;  %1611 = vmatpush.bf16.msra.mxu0 %v1586_v50 }
 0x197   : > { %1176 = vst [vmem:[%s3465_s5] sm:$0xff] %v1174_v21 }
 0x198   : > { %v1103_v22 = vpop.f32.mrf.mxu0  ;;  %2378 = vmatmul.msk.bf16.vlgmr.msra.gmra.mxu0 %vm909_vm0, %v3490_v27 }
 0x199   : > { %v1169_v23 = vsub.f32 %v1041_v20, %v1103_v22  ;;  %1671 = vmatpush.bf16.msrb.mxu0 %v3496_v30 }
 0x19a   : > { %v1165_v36 = vpop.f32.mrf.mxu1 }
 0x19b   : > { %1171 = vst [vmem:[%s3463_s22 + $0x8] sm:$0xff] %v1169_v23  ;;  %v1173_v37 = vsub.f32 %v1165_v36, %v1041_v20  ;;  %v1281_v38 = vpop.f32.mrf.mxu3 }
 0x19c   : > { %v1288_v53 = vsub.f32 %v1281_v38, %v3668_v4 }
 0x19d   : > { %v1175_v0 = vsub.f32 %v1173_v37, %v1103_v22  ;;  %1672 = vmatpush.bf16.msrb.mxu0 %v3522_v42  ;;  %v1588_v42 = vadd.f32 %v1539_v34, %v3716_v63 }
 0x19e   : > { %v1290_v2 = vsub.f32 %v1288_v53, %v3674_v6 }
 0x19f   : > { %1177 = vst [vmem:[%s3465_s5 + $0x8] sm:$0xff] %v1175_v0 }
 0x1a0   : > { %v1294_v4 = vadd.f32 %v1290_v2, %v3680_v7 }
 0x1a1   : > { %1673 = vmatpush.bf16.msrb.mxu0 %v3564_v52 }
 0x1a3   : > { %v1283_v15 = vpop.f32.mrf.mxu3 }
 0x1a4   : > { %v1289_v16 = vsub.f32 %v1283_v15, %v3670_v5 }
 0x1a5   : > { %1674 = vmatpush.bf16.msrb.mxu0 %v3572_v55 }
 0x1a6   : > { %v1291_v17 = vsub.f32 %v1289_v16, %v3682_v9 }
 0x1a8   : > { %v1293_v18 = vpack.c.bf16 %v1291_v17, %v1290_v2  ;;  %v1295_v19 = vadd.f32 %v1291_v17, %v3686_v11 }
 0x1a9   : > { %1675 = vmatpush.bf16.msrb.mxu0 %v3584_v58 }
 0x1aa   : > { %v1296_v20 = vpack.c.bf16 %v1295_v19, %v1294_v4  ;;  %1319 = vmatmul.bf16.vlgmr.msra.gmra.mxu1 %v1293_v18 }
 0x1ab   : > { %v1426_v30 = vpop.f32.mrf.mxu3  ;;  %1470 = vmatpush.bf16.msra.mxu1 %v3487_v25 }
 0x1ac   : > { %1333 = vmatmul.bf16.vlgmr.msrb.gmra.mxu2 %v1296_v20 }
 0x1ad   : > { %1643 = vmatpush.bf16.msrb.mxu2 %v3487_v25  ;;  %1676 = vmatpush.bf16.msrb.mxu0 %v3592_v60 }
 0x1af   : > { %1471 = vmatpush.bf16.msra.mxu1 %v3503_v33 }
 0x1b1   : > { %1644 = vmatpush.bf16.msrb.mxu2 %v3503_v33  ;;  %1677 = vmatpush.bf16.msrb.mxu0 %v3603_v1  ;;  %v1587_v33 = vadd.f32 %v1538_v62, %v3714_v59 }
 0x1b3   : > { %v1428_v27 = vpop.f32.mrf.mxu3  ;;  %1472 = vmatpush.bf16.msra.mxu1 %v3527_v43  ;;  %v1589_v52 = vpack.c.bf16 %v1588_v42, %v1587_v33 }
 0x1b5   : > { %1645 = vmatpush.bf16.msrb.mxu2 %v3527_v43  ;;  %1678 = vmatpush.bf16.msrb.mxu0 %v3610_v3 }
 0x1b7   : > { %1473 = vmatpush.bf16.msra.mxu1 %v3546_v48 }
 0x1b9   : > { %1646 = vmatpush.bf16.msrb.mxu2 %v3546_v48 }
 0x1ba   : > { %2358 = vmatmul.msk.bf16.vlgmr.msrb.gmra.mxu1 %vm909_vm0, %v3517_v41 }
 0x1bb   : > { %v1440_v25 = vpop.f32.mrf.mxu3  ;;  %1474 = vmatpush.bf16.msra.mxu1 %v3550_v49 }
 0x1bc   : > { %v1459_v55 = vsub.f32 %v1426_v30, %v1440_v25 }
 0x1bd   : > { %1647 = vmatpush.bf16.msrb.mxu2 %v3550_v49 }
 0x1bf   : > { %1475 = vmatpush.bf16.msra.mxu1 %v3562_v51 }
 0x1c1   : > { %1648 = vmatpush.bf16.msrb.mxu2 %v3562_v51  ;;  %v1306_v51 = vpop.f32.mrf.mxu0 }
 0x1c3   : > { %v1442_v43 = vpop.f32.mrf.mxu3  ;;  %1476 = vmatpush.bf16.msra.mxu1 %v3570_v54 }
 0x1c4   : > { %v1460_v48 = vsub.f32 %v1428_v27, %v1442_v43 }
 0x1c5   : > { %1649 = vmatpush.bf16.msrb.mxu2 %v3570_v54 }
 0x1c6   : > { %v1465_v49 = vpack.c.bf16 %v1460_v48, %v1459_v55 }
 0x1c7   : > { %1477 = vmatpush.bf16.msra.mxu1 %v3582_v57 }
 0x1c9   : > { %1650 = vmatpush.bf16.msrb.mxu2 %v3582_v57  ;;  %v1308_v58 = vpop.f32.mrf.mxu0 }
 0x1ca   : > { %1478 = vmatmul.bf16.vlgmr.msra.gmra.mxu1 %v1465_v49 }
 0x1cb   : > { %1625 = vmatpush.bf16.msrb.mxu1 %v1589_v52 }
 0x1da   : > { %2379 = vmatmul.msk.bf16.vlgmr.msrb.gmra.mxu1 %vm909_vm0, %v3517_v41 }
 0x1e7   : > { %v1599_v54 = vpop.f32.mrf.mxu0 }
 0x1ef   : > { %v1601_v63 = vpop.f32.mrf.mxu0 }
 0x215   : > { %v1613_v38 = vpop.f32.mrf.mxu0 }
 0x216   : > { %v1632_v12 = vsub.f32 %v1599_v54, %v1613_v38 }
 0x21d   : > { %v1615_v0 = vpop.f32.mrf.mxu0 }
 0x21e   : > { %v1633_v34 = vsub.f32 %v1601_v63, %v1615_v0 }
 0x220   : > { %v1638_v46 = vpack.c.bf16 %v1633_v34, %v1632_v12 }
 0x227   : > { %v1320_v60 = vpop.f32.mrf.mxu1 }
 0x228   : > { %v1339_v1 = vsub.f32 %v1306_v51, %v1320_v60 }
 0x22a   : > { %2338 = vst [vmem:[%s3463_s22 + $0x10] sm:$0xff] %v1339_v1 }
 0x22f   : > { %v1322_v3 = vpop.f32.mrf.mxu1  ;;  %v1334_v5 = vpop.f32.mrf.mxu2 }
 0x230   : > { %v1340_v6 = vsub.f32 %v1308_v58, %v1322_v3  ;;  %v1344_v7 = vsub.f32 %v1334_v5, %v1306_v51 }
 0x232   : > { %2339 = vst [vmem:[%s3463_s22 + $0x18] sm:$0xff] %v1340_v6  ;;  %v1346_v9 = vsub.f32 %v1344_v7, %v1320_v60 }
 0x234   : > { %2340 = vst [vmem:[%s3465_s5 + $0x10] sm:$0xff] %v1346_v9 }
 0x237   : > { %v1336_v11 = vpop.f32.mrf.mxu2  ;;  %v1454_v57 = vpop.f32.mrf.mxu1 }
 0x238   : > { %v1345_v59 = vsub.f32 %v1336_v11, %v1308_v58  ;;  %v1461_v41 = vsub.f32 %v1454_v57, %v1426_v30 }
 0x23a   : > { %v1347_v21 = vsub.f32 %v1345_v59, %v1322_v3  ;;  %v1463_v23 = vsub.f32 %v1461_v41, %v1440_v25 }
 0x23c   : > { %2341 = vst [vmem:[%s3465_s5 + $0x18] sm:$0xff] %v1347_v21  ;;  %v1467_v39 = vadd.f32 %v1463_v23, %v1459_v55 }
 0x23f   : > { %v1456_v22 = vpop.f32.mrf.mxu1 }
 0x240   : > { %v1462_v36 = vsub.f32 %v1456_v22, %v1428_v27 }
 0x242   : > { %v1464_v37 = vsub.f32 %v1462_v36, %v1442_v43 }
 0x244   : > { %v1466_v40 = vpack.c.bf16 %v1464_v37, %v1463_v23  ;;  %v1468_v47 = vadd.f32 %v1464_v37, %v1460_v48 }
 0x246   : > { %v1469_v61 = vpack.c.bf16 %v1468_v47, %v1467_v39  ;;  %1492 = vmatmul.bf16.vlgmr.msra.gmra.mxu2 %v1466_v40 }
 0x247   : > { %v3786_v62 = vpop.f32.mrf.mxu1 }
 0x248   : > { %1506 = vmatmul.bf16.vlgmr.msra.gmra.mxu3 %v1469_v61 }
 0x24f   : > { %v3788_v24 = vpop.f32.mrf.mxu1 }
 0x256   : > { %1651 = vmatmul.bf16.vlgmr.msrb.gmra.mxu2 %v1638_v46 }
 0x257   : > { %v1627_v13 = vpop.f32.mrf.mxu1 }
 0x258   : > { %v1634_v50 = vsub.f32 %v1627_v13, %v1599_v54 }
 0x25a   : > { %v1636_v15 = vsub.f32 %v1634_v50, %v1613_v38 }
 0x25c   : > { %v1640_v17 = vadd.f32 %v1636_v15, %v1632_v12 }
 0x25f   : > { %v1629_v53 = vpop.f32.mrf.mxu1 }
 0x260   : > { %v1635_v2 = vsub.f32 %v1629_v53, %v1601_v63 }
 0x262   : > { %v1637_v16 = vsub.f32 %v1635_v2, %v1615_v0 }
 0x264   : > { %v1639_v4 = vpack.c.bf16 %v1637_v16, %v1636_v15  ;;  %v1641_v18 = vadd.f32 %v1637_v16, %v1633_v34 }
 0x266   : > { %v1642_v19 = vpack.c.bf16 %v1641_v18, %v1640_v17  ;;  %1665 = vmatmul.bf16.vlgmr.msrb.gmra.mxu3 %v1639_v4 }
 0x268   : > { %1679 = vmatmul.bf16.vlgmr.msrb.gmra.mxu0 %v1642_v19 }
 0x269   : > { %2931 = shalt.err (!%p2928_p12)
}
 0x26a   : > { %s3167_s28 = smov 128   ;;  %s3168_s29 = smov 8  }
 0x26b   : > { %2482 = dma.vmem_to_hbm [thread:$0]  (%p3341_p4), %s1754_s10, 1024, %s1756_s21, %s4101_s25, %s3167_s28, %s3167_s28, %s3168_s29  }
 0x26c   : > { %s4143_s18 = sld [smem:[#allocation50_spill]]  ;;  %s1733_s24 = sshll.u32 %s3459_s13, 4  ;;  %s1734_s24 = int_to_ptr.vmem [resolvable:$true] %s1733_s24 }
 0x26d   : > { %s1698_s20 = scalar_lea.sflag [#allocation4], %s3424_s26 }
 0x272   : > { %s4144_s23 = smov %s4143_s18  ;;  %s1732_s15 = scalar_lea.hbm %s4143_s18, %s3791_s3 }
 0x273   : > { %s1735_s27 = sshll.u32 %s1732_s15, 4  ;;  %s2952_s10 = scalar_lea.hbm %s4144_s23, 128  ;;  %s1736_s27 = int_to_ptr.hbm [resolvable:$true] %s1735_s27 }
 0x274   : > { %s2946_s12 = sshra.s32 %s1736_s27, 4  ;;  %s2947_s12 = int_to_ptr.hbm [resolvable:$true] %s2946_s12 }
 0x275   : > { %s2948_s0 = scalar_lea.hbm %s2947_s12, 64  ;;  %p2953_p3 = scmp.lt.s32.totalorder %s2947_s12, %s4144_s23 }
 0x276   : > { %p2949_p0 = scmp.ne.s32.totalorder %s2947_s12, %s2948_s0  ;;  %p2954_p1 = scmp.lt.s32.totalorder %s2952_s10, %s2948_s0 }
 0x278   : > { %p2950_p2 = pnand %p2949_p0, %p3341_p4  ;;  %p2955_p5 = por %p2954_p1, %p2953_p3 }
 0x27a   : > { %p2951_p9 = pneg %p2950_p2 }
 0x27c   : > { %p2956_p6 = pnand %p2955_p5, %p2951_p9 }
 0x27e   : > { %2959 = shalt.err (!%p2956_p6)
}
 0x27f   : > { %2481 = dma.vmem_to_hbm [thread:$0]  (%p3341_p4), %s1734_s24, 1024, %s1736_s27, %s1698_s20, %s3167_s28, %s3167_s28, %s3168_s29   ;;  %2618 = vrsqrt.f32 %v3498_v31  ;;  %v1200_v20 = vmul.f32 %v3492_v28, %v3492_v28  ;;  %v1202_v30 = vmul.f32 %v3529_v44, %v3529_v44  ;;  %v1201_v25 = vmul.f32 %v3494_v29, %v3494_v29 }
 0x280   : > { %2620 = vrsqrt.f32 %v3500_v32  ;;  %v1203_v33 = vmul.f32 %v3531_v45, %v3531_v45  ;;  %v1373_v42 = vmul.f32 %v3624_v8, %v3624_v8  ;;  %v1375_v43 = vmul.f32 %v3650_v26, %v3650_v26  ;;  %s3169_s0 = smov [#allocation24]   ;;  %s4145_s13 = sld [smem:[#allocation55_spill]] }
 0x281   : > { %v1374_v28 = vmul.f32 %v3627_v10, %v3627_v10  ;;  %v1376_v44 = vmul.f32 %v3653_v35, %v3653_v35  ;;  %v3852_v55 = vadd.f32 %v1202_v30, %v1200_v20  ;;  %vm874_vm1 = vcmp.eq.f32.partialorder %v3498_v31, inf  ;;  %s1830_s2 = sshll.u32 %s3169_s0, 4  ;;  %s4146_s18 = sld [smem:[#allocation53_spill]]  ;;  %s1831_s2 = int_to_ptr.vmem [resolvable:$true] %s1830_s2 }
 0x282   : > { %v3854_v29 = vadd.f32 %v1203_v33, %v1201_v25  ;;  %v3857_v49 = vadd.f32 %v1375_v43, %v1373_v42  ;;  %vm876_vm2 = vcmp.eq.f32.partialorder %v3498_v31, 0.0  ;;  %vm886_vm3 = vcmp.eq.f32.partialorder %v3500_v32, inf  ;;  %v893_v33 = vld [vmem:[#allocation24] sm:$0xff]  ;;  %v894_v42 = vld [vmem:[#allocation24 + $0x8] sm:$0xff]  ;;  %s4148_s12 = sld [smem:[#allocation52_spill]]  ;;  %s1793_s26 = sshll.u32 %s3465_s5, 4  ;;  %s1794_s26 = int_to_ptr.vmem [resolvable:$true] %s1793_s26 }
 0x283   : > { %v3859_v8 = vadd.f32 %v1376_v44, %v1374_v28  ;;  %2622 = vrsqrt.f32 %v3852_v55  ;;  %v877_v46 = vand.u32 2147483648, %v3498_v31  ;;  %vm888_vm4 = vcmp.eq.f32.partialorder %v3500_v32, 0.0  ;;  %s1813_s1 = sshll.u32 %s3467_s16, 4  ;;  %s3978_s1 = int_to_ptr.vmem [resolvable:$true] %s1813_s1 }
 0x284   : > { %2624 = vrsqrt.f32 %v3854_v29  ;;  %v889_v13 = vand.u32 2147483648, %v3500_v32  ;;  %vm1213_vm5 = vcmp.eq.f32.partialorder %v3852_v55, inf  ;;  %vm1225_vm6 = vcmp.eq.f32.partialorder %v3854_v29, inf }
 0x285   : > { %v2619_v27 = vpop.eup %2618  ;;  %2626 = vrsqrt.f32 %v3857_v49  ;;  %vm1215_vm7 = vcmp.eq.f32.partialorder %v3852_v55, 0.0  ;;  %vm1227_vm8 = vcmp.eq.f32.partialorder %v3854_v29, 0.0  ;;  %vm1386_vm9 = vcmp.eq.f32.partialorder %v3857_v49, inf }
 0x286   : > { %v2621_v48 = vpop.eup %2620  ;;  %v868_v52 = vmul.f32 %v2619_v27, %v3498_v31  ;;  %2628 = vrsqrt.f32 %v3859_v8  ;;  %vm1388_vm10 = vcmp.eq.f32.partialorder %v3857_v49, 0.0  ;;  %vm1398_vm11 = vcmp.eq.f32.partialorder %v3859_v8, inf  ;;  %s1832_s25 = sshll.u32 %s4145_s13, 4  ;;  %s1833_s25 = int_to_ptr.hbm [resolvable:$true] %s1832_s25 }
 0x287   : > { %v880_v45 = vmul.f32 %v2621_v48, %v3500_v32  ;;  %2630 = vrsqrt.f32 %v3741_v14  ;;  %vm1400_vm12 = vcmp.eq.f32.partialorder %v3859_v8, 0.0  ;;  %vm1559_vm13 = vcmp.eq.f32.partialorder %v3741_v14, inf  ;;  %s4147_s24 = smov %s4146_s18  ;;  %s1792_s15 = scalar_lea.hbm %s4146_s18, %s3791_s3 }
 0x288   : > { %v869_v26 = vmul.f32 %v2619_v27, %v868_v52  ;;  %2632 = vrsqrt.f32 %v3743_v56  ;;  %vm1561_vm14 = vcmp.eq.f32.partialorder %v3741_v14, 0.0  ;;  %vm1571_vm15 = vcmp.eq.f32.partialorder %v3743_v56, inf  ;;  %s1772_s10 = scalar_lea.hbm %s4148_s12, %s3791_s3  ;;  %s3964_s13 = sshll.u32 %s1792_s15, 4  ;;  %s1796_s13 = int_to_ptr.hbm [resolvable:$true] %s3964_s13 }
 0x289   : > { %v881_v10 = vmul.f32 %v2621_v48, %v880_v45  ;;  %v2623_v51 = vpop.eup %2622  ;;  %vm1573_vm0 = vcmp.eq.f32.partialorder %v3743_v56, 0.0  ;;  %s3967_s11 = sshll.u32 %s1772_s10, 4  ;;  %s3002_s15 = sshra.s32 %s1796_s13, 4  ;;  %s1776_s11 = int_to_ptr.hbm [resolvable:$true] %s3967_s11  ;;  %s3003_s15 = int_to_ptr.hbm [resolvable:$true] %s3002_s15 }
 0x28a   : > { %v870_v35 = vmul.f32 0.5, %v869_v26  ;;  %v2625_v60 = vpop.eup %2624  ;;  %v1207_v11 = vmul.f32 %v2623_v51, %v3852_v55  ;;  %v896_v26 = vadd.f32 %v894_v42, %v3500_v32  ;;  %s3004_s27 = scalar_lea.hbm %s3003_s15, 64  ;;  %s3008_s10 = scalar_lea.hbm %s4147_s24, 128 }
 0x28b   : > { %v882_v58 = vmul.f32 0.5, %v881_v10  ;;  %v2627_v1 = vpop.eup %2626  ;;  %v1219_v57 = vmul.f32 %v2625_v60, %v3854_v29  ;;  %p3005_p8 = scmp.ne.s32.totalorder %s3003_s15, %s3004_s27  ;;  %p3009_p12 = scmp.lt.s32.totalorder %s3003_s15, %s4147_s24 }
 0x28c   : > { %v871_v54 = vsub.f32 1.5, %v870_v35  ;;  %v2629_v3 = vpop.eup %2628  ;;  %v1380_v59 = vmul.f32 %v2627_v1, %v3857_v49  ;;  %v1208_v36 = vmul.f32 %v2623_v51, %v1207_v11  ;;  %p3010_p0 = scmp.lt.s32.totalorder %s3008_s10, %s3004_s27 }
 0x28d   : > { %v2631_v5 = vpop.eup %2630  ;;  %v883_v6 = vsub.f32 1.5, %v882_v58  ;;  %v1392_v21 = vmul.f32 %v2629_v3, %v3859_v8  ;;  %v1220_v37 = vmul.f32 %v2625_v60, %v1219_v57  ;;  %p3006_p10 = pnand %p3005_p8, %p3341_p4 }
 0x28e   : > { %v2633_v7 = vpop.eup %2632  ;;  %v872_v9 = vmul.f32 %v2619_v27, %v871_v54  ;;  %v1553_v41 = vmul.f32 %v2631_v5, %v3741_v14  ;;  %v1381_v38 = vmul.f32 %v2627_v1, %v1380_v59  ;;  %v1209_v15 = vmul.f32 0.5, %v1208_v36  ;;  %p3011_p2 = por %p3010_p0, %p3009_p12 }
 0x28f   : > { %v884_v63 = vmul.f32 %v2621_v48, %v883_v6  ;;  %v1565_v22 = vmul.f32 %v2633_v7, %v3743_v56  ;;  %v1393_v40 = vmul.f32 %v2629_v3, %v1392_v21  ;;  %v1221_v2 = vmul.f32 0.5, %v1220_v37  ;;  %p3007_p11 = pneg %p3006_p10 }
 0x290   : > { %v873_v23 = vmul.f32 %v872_v9, %v3498_v31  ;;  %v1554_v47 = vmul.f32 %v2631_v5, %v1553_v41  ;;  %v1382_v16 = vmul.f32 0.5, %v1381_v38  ;;  %v1210_v30 = vsub.f32 1.5, %v1209_v15 }
 0x291   : > { %v885_v39 = vmul.f32 %v884_v63, %v3500_v32  ;;  %v1566_v61 = vmul.f32 %v2633_v7, %v1565_v22  ;;  %v1394_v4 = vmul.f32 0.5, %v1393_v40  ;;  %v1222_v27 = vsub.f32 1.5, %v1221_v2  ;;  %p3012_p9 = pnand %p3011_p2, %p3007_p11 }
 0x292   : > { %v875_v34 = vsel %vm874_vm1, %v3498_v31, %v873_v23  ;;  %v1555_v18 = vmul.f32 0.5, %v1554_v47  ;;  %v1383_v25 = vsub.f32 1.5, %v1382_v16  ;;  %v1211_v44 = vmul.f32 %v2623_v51, %v1210_v30 }
 0x293   : > { %v887_v17 = vsel %vm886_vm3, %v3500_v32, %v885_v39  ;;  %v1567_v19 = vmul.f32 0.5, %v1566_v61  ;;  %v1395_v43 = vsub.f32 1.5, %v1394_v4  ;;  %v1223_v52 = vmul.f32 %v2625_v60, %v1222_v27 }
 0x294   : > { %v1556_v48 = vsub.f32 1.5, %v1555_v18  ;;  %v1384_v45 = vmul.f32 %v2627_v1, %v1383_v25  ;;  %v1212_v11 = vmul.f32 %v1211_v44, %v3852_v55  ;;  %v1216_v60 = vand.u32 2147483648, %v3852_v55 }
 0x295   : > { %v1568_v28 = vsub.f32 1.5, %v1567_v19  ;;  %v1396_v35 = vmul.f32 %v2629_v3, %v1395_v43  ;;  %v1224_v57 = vmul.f32 %v1223_v52, %v3854_v29  ;;  %v1228_v1 = vand.u32 2147483648, %v3854_v29 }
 0x296   : > { %v1557_v58 = vmul.f32 %v2631_v5, %v1556_v48  ;;  %v1385_v59 = vmul.f32 %v1384_v45, %v3857_v49  ;;  %v1214_v5 = vsel %vm1213_vm5, %v3852_v55, %v1212_v11  ;;  %v878_v63 = vsel %vm876_vm2, %v877_v46, %v875_v34 }
 0x297   : > { %v1569_v54 = vmul.f32 %v2633_v7, %v1568_v28  ;;  %v1226_v7 = vsel %vm1225_vm6, %v3854_v29, %v1224_v57  ;;  %v890_v21 = vsel %vm888_vm4, %v889_v13, %v887_v17  ;;  %v1217_v41 = vsel %vm1215_vm7, %v1216_v60, %v1214_v5  ;;  %891 = vst [vmem:[%s3467_s16] sm:$0xff] %v878_v63 }
 0x298   : > { %892 = vst [vmem:[%s3467_s16 + $0x8] sm:$0xff] %v890_v21  ;;  %v1397_v32 = vmul.f32 %v1396_v35, %v3859_v8  ;;  %v1401_v23 = vand.u32 2147483648, %v3859_v8  ;;  %v1558_v36 = vmul.f32 %v1557_v58, %v3741_v14  ;;  %v1562_v39 = vand.u32 2147483648, %v3741_v14 }
 0x299   : > { %2333 = vst [vmem:[%s3467_s16 + $0x10] sm:$0xff] %v1217_v41  ;;  %v1570_v61 = vmul.f32 %v1569_v54, %v3743_v56  ;;  %v1236_v34 = vadd.f32 %v3854_v29, %v896_v26 }
 0x29a   : > { %v1399_v38 = vsel %vm1398_vm11, %v3859_v8, %v1397_v32  ;;  %v1560_v47 = vsel %vm1559_vm13, %v3741_v14, %v1558_v36 }
 0x29b   : > { %v1402_v40 = vsel %vm1400_vm12, %v1401_v23, %v1399_v38  ;;  %v1572_v46 = vsel %vm1571_vm15, %v3743_v56, %v1570_v61 }
 0x29c   : > { %2355 = vst [vmem:[%s3467_s16 + $0x28] sm:$0xff] %v1402_v40 }
 0x2c9   : > { %v1493_v0 = vpop.f32.mrf.mxu2 }
 0x2ca   : > { %v1512_v12 = vsub.f32 %v3786_v62, %v1493_v0 }
 0x2cb   : > { %v1507_v50 = vpop.f32.mrf.mxu3 }
 0x2cc   : > { %2359 = vst [vmem:[%s3463_s22 + $0x20] sm:$0xff] %v1512_v12  ;;  %v1517_v53 = vsub.f32 %v1507_v50, %v3786_v62  ;;  %v895_v62 = vadd.f32 %v893_v33, %v3498_v31  ;;  %v1389_v31 = vand.u32 2147483648, %v3857_v49  ;;  %v1574_v12 = vand.u32 2147483648, %v3743_v56 }
 0x2ce   : > { %v1519_v20 = vsub.f32 %v1517_v53, %v1493_v0  ;;  %v1235_v6 = vadd.f32 %v3852_v55, %v895_v62  ;;  %v1387_v55 = vsel %vm1386_vm9, %v3857_v49, %v1385_v59  ;;  %v1563_v0 = vsel %vm1561_vm14, %v1562_v39, %v1560_v47 }
 0x2cf   : > { %v1390_v37 = vsel %vm1388_vm10, %v1389_v31, %v1387_v55  ;;  %v1575_v50 = vsel %vm1573_vm0, %v1574_v12, %v1572_v46  ;;  %2375 = vst [vmem:[%s3467_s16 + $0x30] sm:$0xff] %v1563_v0  ;;  %v1409_v53 = vadd.f32 %v3859_v8, %v1236_v34 }
 0x2d0   : > { %2361 = vst [vmem:[%s3465_s5 + $0x20] sm:$0xff] %v1519_v20  ;;  %v1408_v13 = vadd.f32 %v3857_v49, %v1235_v6 }
 0x2d1   : > { %v1495_v10 = vpop.f32.mrf.mxu2  ;;  %2354 = vst [vmem:[%s3467_s16 + $0x20] sm:$0xff] %v1390_v37  ;;  %v1582_v15 = vadd.f32 %v3743_v56, %v1409_v53 }
 0x2d2   : > { %v1513_v9 = vsub.f32 %v3788_v24, %v1495_v10  ;;  %2376 = vst [vmem:[%s3467_s16 + $0x38] sm:$0xff] %v1575_v50  ;;  %v1581_v29 = vadd.f32 %v3741_v14, %v1408_v13 }
 0x2d3   : > { %v1509_v51 = vpop.f32.mrf.mxu3  ;;  %1584 = vst [vmem:[#allocation24 + $0x8] sm:$0xff] %v1582_v15 }
 0x2d4   : > { %2360 = vst [vmem:[%s3463_s22 + $0x28] sm:$0xff] %v1513_v9  ;;  %v1518_v3 = vsub.f32 %v1509_v51, %v3788_v24  ;;  %v1229_v24 = vsel %vm1227_vm8, %v1228_v1, %v1226_v7 }
 0x2d5   : > { %2334 = vst [vmem:[%s3467_s16 + $0x18] sm:$0xff] %v1229_v24 }
 0x2d6   : > { %v1520_v22 = vsub.f32 %v1518_v3, %v1495_v10  ;;  %1583 = vst [vmem:[#allocation24] sm:$0xff] %v1581_v29 }
 0x2d7   : > { %2487 = dma.vmem_to_hbm [thread:$0]  (%p294_p13), %s1831_s2, 256, %s1833_s25, [#allocation25], %s3167_s28, %s3167_s28, %s3168_s29  }
 0x2d8   : > { %2362 = vst [vmem:[%s3465_s5 + $0x28] sm:$0xff] %v1520_v22  ;;  %s4149_s2 = sld [smem:[#allocation54_spill]]  ;;  %s1773_s25 = sshll.u32 %s3463_s22, 4  ;;  %s3974_s25 = int_to_ptr.vmem [resolvable:$true] %s1773_s25 }
 0x2d9   : > { %v1652_v49 = vpop.f32.mrf.mxu2 }
 0x2de   : > { %s1812_s4 = scalar_lea.hbm %s4149_s2, %s3791_s3  ;;  %s1713_s3 = scalar_lea.sflag [#allocation22], %s3435_s14 }
 0x2df   : > { %s3970_s18 = sshll.u32 %s1812_s4, 4  ;;  %s1816_s18 = int_to_ptr.hbm [resolvable:$true] %s3970_s18 }
 0x2e1   : > { %v1654_v4 = vpop.f32.mrf.mxu2 }
 0x2e5   : > { %v1680_v8 = vpop.f32.mrf.mxu0 }
 0x2e6   : > { %v1690_v2 = vsub.f32 %v1680_v8, %v1652_v49 }
 0x2e9   : > { %v1666_v14 = vpop.f32.mrf.mxu3 }
 0x2ea   : > { %v1685_v16 = vsub.f32 %v1652_v49, %v1666_v14  ;;  %v1692_v17 = vsub.f32 %v1690_v2, %v1666_v14 }
 0x2ec   : > { %2380 = vst [vmem:[%s3463_s22 + $0x30] sm:$0xff] %v1685_v16 }
 0x2ed   : > { %2382 = vst [vmem:[%s3465_s5 + $0x30] sm:$0xff] %v1692_v17  ;;  %v1682_v56 = vpop.f32.mrf.mxu0 }
 0x2ee   : > { %v1691_v18 = vsub.f32 %v1682_v56, %v1654_v4 }
 0x2f1   : > { %v1668_v19 = vpop.f32.mrf.mxu3 }
 0x2f2   : > { %v1686_v20 = vsub.f32 %v1654_v4, %v1668_v19  ;;  %v1693_v30 = vsub.f32 %v1691_v18, %v1668_v19 }
 0x2f4   : > { %2381 = vst [vmem:[%s3463_s22 + $0x38] sm:$0xff] %v1686_v20 }
 0x2f5   : > { %2383 = vst [vmem:[%s3465_s5 + $0x38] sm:$0xff] %v1693_v30 }
 0x2f6   : > { %3015 = shalt.err (!%p3012_p9)
}
 0x2f7   : > { %2484 = dma.vmem_to_hbm [thread:$0]  (%p3341_p4), %s1794_s26, 1024, %s1796_s13, %s1713_s3, %s3167_s28, %s3167_s28, %s3168_s29  }
 0x2f8   : > { %s3030_s5 = sshra.s32 %s1776_s11, 4  ;;  %s3036_s27 = scalar_lea.hbm %s4148_s12, 128  ;;  %s3031_s5 = int_to_ptr.hbm [resolvable:$true] %s3030_s5 }
 0x2f9   : > { %s3032_s0 = scalar_lea.hbm %s3031_s5, 64  ;;  %p3037_p6 = scmp.lt.s32.totalorder %s3031_s5, %s4148_s12 }
 0x2fa   : > { %p3033_p3 = scmp.ne.s32.totalorder %s3031_s5, %s3032_s0  ;;  %p3038_p8 = scmp.lt.s32.totalorder %s3036_s27, %s3032_s0 }
 0x2fc   : > { %p3034_p1 = pnand %p3033_p3, %p3341_p4  ;;  %p3039_p10 = por %p3038_p8, %p3037_p6 }
 0x2fe   : > { %p3035_p5 = pneg %p3034_p1 }
 0x300   : > { %p3040_p11 = pnand %p3039_p10, %p3035_p5 }
 0x302   : > { %3043 = shalt.err (!%p3040_p11)
}
 0x303   : > { %s4150_s26 = scalar_lea.sflag [#allocation19], %s3435_s14  ;;  %s3058_s13 = sshra.s32 %s1816_s18, 4  ;;  %s3059_s13 = int_to_ptr.hbm [resolvable:$true] %s3058_s13 }
 0x304   : > { %2483 = dma.vmem_to_hbm [thread:$0]  (%p3341_p4), %s3974_s25, 1024, %s1776_s11, %s4150_s26, %s3167_s28, %s3167_s28, %s3168_s29  }
 0x305   : > { %s3060_s10 = scalar_lea.hbm %s3059_s13, 64  ;;  %s3064_s5 = scalar_lea.hbm %s4149_s2, 128 }
 0x306   : > { %p3061_p12 = scmp.ne.s32.totalorder %s3059_s13, %s3060_s10  ;;  %p3065_p9 = scmp.lt.s32.totalorder %s3059_s13, %s4149_s2 }
 0x307   : > { %p3066_p3 = scmp.lt.s32.totalorder %s3064_s5, %s3060_s10 }
 0x308   : > { %p3062_p0 = pnand %p3061_p12, %p3341_p4 }
 0x309   : > { %p3067_p1 = por %p3066_p3, %p3065_p9 }
 0x30a   : > { %p3063_p2 = pneg %p3062_p0 }
 0x30c   : > { %p3068_p5 = pnand %p3067_p1, %p3063_p2 }
 0x30e   : > { %3071 = shalt.err (!%p3068_p5)
}
 0x30f   : > { %2485 = dma.vmem_to_hbm [thread:$0]  (%p3341_p4), %s3978_s1, 1024, %s1816_s18, %s1713_s3, %s3167_s28, %s3167_s28, %s3168_s29  }
 0x310   : > { %3117 = dma.done.wait (%p294_p13), [#allocation25], 256  }
 0x311   : > { %3119 = vsyncadd (%p294_p13), [#allocation25], 4294967040 }
 0x312 PF: > { %s4151_s25 = sld [smem:[#allocation35_spill]] }
 0x313   : > { %s4153_s15 = sld [smem:[#allocation38_spill]] }
 0x318   : > { %s1852_s9 = sand.u32 1, %s4151_s25  }
 0x319   : > { %p4154_p6 = scmp.ge.s32.totalorder %s4153_s15, 2  ;;  %s1853_s14 = scalar_lea.sflag [#allocation4], %s1852_s9 }
 0x31b   : > { %p2525_p8 = pnand %p4154_p6, %p3349_p7 }
 0x31d   : > { %p2526_p10 = pneg %p2525_p8 }
 0x31f   : > { %3121 = dma.done.wait (%p2526_p10), %s1853_s14, 1024  }
 0x320   : > { %3123 = vsyncadd (%p2526_p10), %s1853_s14, 4294966272  ;;  %s4155_s27 = sadd.s32 4294967294, %s4153_s15  }
 0x321   : > { %s1862_s28 = sand.u32 1, %s4155_s27  }
 0x322   : > { %s1863_s29 = scalar_lea.sflag [#allocation19], %s1862_s28 }
 0x323   : > { %3125 = dma.done.wait (%p2526_p10), %s1863_s29, 2048  }
 0x324   : > { %3127 = vsyncadd (%p2526_p10), %s1863_s29, 4294965248  ;;  %s1883_s19 = scalar_lea.sflag [#allocation22], %s1862_s28 }
 0x325   : > { %3129 = dma.done.wait (%p2526_p10), %s1883_s19, 2048  }
 0x326   : > { %3131 = vsyncadd (%p2526_p10), %s1883_s19, 4294965248  ;;  %s44_s18 = sadd.s32 1, %s4153_s15   ;;  %s4156_s1 = sld [smem:[#allocation36_spill]] }
 0x327   : > { %p41_p13 = scmp.ge.s32.totalorder %s44_s18, 4   ;;  %s4157_s15 = sld [smem:[#allocation41_spill]] }
 0x328   : > { %s4158_s3 = sld [smem:[#allocation39_spill]]  ;;  %s4159_s29 = smov %s3138_s30 }
 0x329   : > { %s4161_s16 = smov %s3150_s17 }
 0x32a   :  { %43 = sbr.rel (!%p41_p13) target bundleno = 30 (0x1e), region = 254 }
 0x32c   : > { %s4160_s30 = smov %s4156_s1 }
 0x32e   : > { %s4162_s17 = smov %s4158_s3 }
 0x32f   :  { %1899 = vsyncpa [#allocation3], 1 }
 0x330   :  { %1901 = vsyncpa [#allocation3 + $0x1], 1 }
 0x331   :  { %1902 = vsyncpa [#allocation6], 1 }
 0x332   :  { %1904 = vsyncpa [#allocation6 + $0x1], 1 }
 0x333   :  { %1905 = vsyncpa [#allocation9], 1 }
 0x334   :  { %1906 = vsyncpa [#allocation12], 1 }
 0x335   :  { %1907 = vsyncpa [#allocation15], 1 }
 0x336   :  { %1908 = vsyncpa [#allocation4], 1 }
 0x337   :  { %1910 = vsyncpa [#allocation4 + $0x1], 1 }
 0x338   :  { %1911 = vsyncpa [#allocation19], 1 }
 0x339   :  { %1913 = vsyncpa [#allocation19 + $0x1], 1 }
 0x33a   :  { %1914 = vsyncpa [#allocation22], 1 }
 0x33b   :  { %1916 = vsyncpa [#allocation22 + $0x1], 1 }
 0x33c   :  { %1917 = vsyncpa [#allocation25], 1 }

</bundles_post_ra>
